<compile_context>
chip_gen: v6e
topology: v6e:2x2x1
jax: 0.10.0
libtpu: 0.0.40
codegen_flags: <defaults>
</compile_context>

<pallas_src>
import math
import numpy as np

import jax
import jax.numpy as jnp
from jax import lax
from jax.experimental import pallas as pl
from jax.experimental.pallas import tpu as pltpu


# ----------------------------------------------------------------------------
# Parameter / helper setup (glue)
# ----------------------------------------------------------------------------
def calculate_k(C, gamma=2, b=1):
    log_term = math.log2(C) / gamma
    k = abs(int((log_term + b / gamma) // 2) * 2 + 1)
    return k


def init_params(C, key):
    k = calculate_k(C)
    keys = jax.random.split(key, 6)
    alpha = jax.random.uniform(keys[0], (1,), jnp.float32)[0]   # torch.rand(1)
    beta = jax.random.uniform(keys[1], (1,), jnp.float32)[0]    # torch.rand(1)
    # Conv1d(C, C, kernel_size=k, padding=k//2)
    w1d = jax.random.normal(keys[2], (C, C, k), jnp.float32) / math.sqrt(C * k)
    b1d = jax.random.normal(keys[3], (C,), jnp.float32) * 0.05
    # SpatialAttentionModule fixed random attention map (1, C, 1, 1)
    att_map = jax.random.normal(keys[4], (C,), jnp.float32)
    # shared Conv2d(2, 1, kernel_size=7, padding=3, bias=False)
    w2d = jax.random.normal(keys[5], (1, 2, 7, 7), jnp.float32) / math.sqrt(2 * 49)

    # static channel-separation masks (attention_map is fixed at init time)
    C_im = int(C * 0.5)
    C_im = C_im if C_im % 2 == 0 else C_im + 1
    order = np.argsort(-np.asarray(att_map), kind="stable")
    imp_mask = np.zeros((C,), np.float32)
    imp_mask[order[:C_im]] = 1.0

    # Conv1d on a length-1 sequence with padding k//2 -> only the middle tap acts.
    wc = np.asarray(w1d)[:, :, k // 2]                 # (C_out, C_in)
    bc = np.asarray(b1d)                               # (C,)

    return dict(
        # kernel-side layouts
        wcT=jnp.asarray(wc.T),                          # (C_in, C_out)
        bc_row=jnp.asarray(bc).reshape(1, C),           # (1, C)
        mask_col=jnp.asarray(imp_mask).reshape(C, 1),   # (C, 1) column, no conversion needed
        eye=jnp.asarray(np.eye(C, dtype=np.float32)),   # (C, C) — row->col turn for a_c only
        scal=jnp.asarray([alpha, beta], dtype=jnp.float32),
        w2d=w2d,                                        # (1, 2, 7, 7) — folded into wmask in wrapper
        # kept only for the pure-JAX reference check
        wc=jnp.asarray(wc), bc=jnp.asarray(bc), mask=jnp.asarray(imp_mask),
        alpha=alpha, beta=beta,
    )


# ----------------------------------------------------------------------------
# Pallas kernel
# ----------------------------------------------------------------------------
def make_ham_kernel(C, W, HW, HWp):
    inv_hw = 1.0 / float(HW)
    inv_c = 1.0 / float(C)
    padded = HWp != HW
    K, PAD = 7, 3

    # static tap list: (tap index, lane roll amount)
    taps = []
    for di in range(K):
        for dj in range(K):
            sft = (di - PAD) * W + (dj - PAD)
            taps.append((di * K + dj, (-sft) % HWp))

    def _body(x, wcT, bc_row, m_col, eye, wmask_ref, alpha, beta, padneg, out_ref):
        # ---- channel attention: adaptive avg/max pooling over spatial (lane reduces) ----
        f_avg = jnp.sum(x, axis=1, keepdims=True) * inv_hw              # (C, 1)
        xm = x if padneg is None else x + padneg                        # pad lanes -> finfo.min
        f_max = jnp.max(xm, axis=1, keepdims=True)                      # (C, 1)
        f_add = 0.5 * (f_avg + f_max) + alpha * f_avg + beta * f_max    # (C, 1)

        # Conv1d middle tap on the VPU (C=8: MXU dot is not worth it — review opt 6).
        y_row = jnp.sum(wcT * f_add, axis=0, keepdims=True) + bc_row    # (1, C)
        a_c_row = jax.nn.sigmoid(y_row)                                 # (1, C)
        # exact row -> column turn for the per-channel scale
        a_c = jnp.sum(eye * a_c_row, axis=1, keepdims=True)             # (C, 1)

        x_refined = x * a_c                                             # (C, HWp)

        # ---- channel separation (zero-mask semantics, exactly like the reference) ----
        f1 = x_refined * m_col
        f2 = x_refined - f1                                             # == x_refined * (1 - m)

        # ---- packed spatial stats: rows = [max_f1, max_f2, avg_f1, avg_f2] ----
        stack = jnp.concatenate(
            [jnp.max(f1, axis=0, keepdims=True),
             jnp.max(f2, axis=0, keepdims=True),
             jnp.sum(f1, axis=0, keepdims=True) * inv_c,
             jnp.sum(f2, axis=0, keepdims=True) * inv_c], axis=0)        # (4, HWp)

        # ---- 7x7 "same" conv: 49 taps, one roll each, precomputed weight*valid masks,
        #      4 round-robin partial accumulators ----
        accs = [None, None, None, None]
        for t, shift in taps:
            rolled = stack if shift == 0 else pltpu.roll(stack, shift=shift, axis=1)
            contrib = wmask_ref[t] * rolled                              # (4, HWp)
            s = t % 4
            accs[s] = contrib if accs[s] is None else accs[s] + contrib
        acc4 = (accs[0] + accs[1]) + (accs[2] + accs[3])                 # (4, HWp)

        # branch conv outputs = max-channel part + avg-channel part
        conv = acc4[0:2, :] + acc4[2:4, :]                               # (2, HWp)
        a_s = jax.nn.sigmoid(conv)
        a_s1 = a_s[0:1, :]
        a_s2 = a_s[1:2, :]

        # ---- fused recombine: f1*A_s1 + f2*A_s2 == x_refined * select(mask, A_s1, A_s2) ----
        out_ref[...] = x_refined * jnp.where(m_col > 0.5, a_s1, a_s2)

    if padded:
        def kernel(x_ref, wcT_ref, bc_ref, mask_ref, eye_ref, wmask_ref,
                   padneg_ref, scal_ref, out_ref):
            _body(x_ref[...], wcT_ref[...], bc_ref[...], mask_ref[...],
                  eye_ref[...], wmask_ref, scal_ref[0], scal_ref[1],
                  padneg_ref[...], out_ref)
    else:
        def kernel(x_ref, wcT_ref, bc_ref, mask_ref, eye_ref, wmask_ref,
                   scal_ref, out_ref):
            _body(x_ref[...], wcT_ref[...], bc_ref[...], mask_ref[...],
                  eye_ref[...], wmask_ref, scal_ref[0], scal_ref[1],
                  None, out_ref)
    return kernel


# ----------------------------------------------------------------------------
# Wrapper
# ----------------------------------------------------------------------------
def _tap_validity(H, W, HW, HWp):
    """Static per-tap source-in-bounds masks over the flattened (padded) lanes."""
    pos = np.arange(HWp)
    row, col = pos // W, pos % W
    in_img = pos < HW
    valid = np.zeros((49, HWp), np.float32)
    for di in range(7):
        for dj in range(7):
            r, c = di - 3, dj - 3
            ok = in_img & (row + r >= 0) & (row + r < H) & (col + c >= 0) & (col + c < W)
            valid[di * 7 + dj] = ok.astype(np.float32)
    return valid


def ham_forward(x_nchw, params):
    B, C, H, W = x_nchw.shape
    assert B == 1, "HAM's A_C.view(1,-1,1,1) only broadcasts correctly for batch=1"
    HW = H * W
    HWp = ((HW + 127) // 128) * 128          # lane-align the flattened spatial axis

    x2 = x_nchw.reshape(C, HW).astype(jnp.float32)
    if HWp != HW:
        x2 = jnp.pad(x2, ((0, 0), (0, HWp - HW)))

    # Precomputed per-tap weight * validity masks, packed (49, 4, HWp):
    # rows [0,1] carry the max-channel tap weight, rows [2,3] the avg-channel weight.
    valid = jnp.asarray(_tap_validity(H, W, HW, HWp))               # (49, HWp)
    w2 = params["w2d"].reshape(2, 49).astype(jnp.float32)           # [max taps; avg taps]
    wm = w2[0][:, None] * valid                                     # (49, HWp)
    wa = w2[1][:, None] * valid
    wmask = jnp.stack([wm, wm, wa, wa], axis=1)                     # (49, 4, HWp)

    vmem = pl.BlockSpec(memory_space=pltpu.MemorySpace.VMEM)
    smem = pl.BlockSpec(memory_space=pltpu.MemorySpace.SMEM)

    args = [x2, params["wcT"], params["bc_row"], params["mask_col"],
            params["eye"], wmask]
    in_specs = [vmem, vmem, vmem, vmem, vmem, vmem]
    if HWp != HW:
        # additive mask for the channel max-pool (finfo.min on pad lanes)
        pn = np.zeros((1, HWp), np.float32)
        pn[0, HW:] = np.finfo(np.float32).min
        args.append(jnp.asarray(pn))
        in_specs.append(vmem)
    args.append(params["scal"])
    in_specs.append(smem)

    # advisory cost estimate (tap loop dominates)
    flops = 49 * 4 * HWp * 2 + 10 * C * HWp + 4 * C * C
    transcendentals = C + 2 * HWp
    bytes_accessed = 4 * (2 * C * HWp + 49 * 4 * HWp + 2 * C * C + 2 * C + HWp + 2)

    out2 = pl.pallas_call(
        make_ham_kernel(C, W, HW, HWp),
        out_shape=jax.ShapeDtypeStruct((C, HWp), jnp.float32),
        in_specs=in_specs,
        out_specs=vmem,
        cost_estimate=pl.CostEstimate(flops=flops,
                                      transcendentals=transcendentals,
                                      bytes_accessed=bytes_accessed),
    )(*args)

    if HWp != HW:
        out2 = out2[:, :HW]
    return out2.reshape(B, C, H, W)


# ----------------------------------------------------------------------------
# Pure-JAX reference (for correctness check only)
# ----------------------------------------------------------------------------
def ham_reference(x, params):
    B, C, H, W = x.shape
    alpha, beta = params["alpha"], params["beta"]
    avg = x.mean(axis=(2, 3), keepdims=True)
    mx = x.max(axis=(2, 3), keepdims=True)
    f_add = 0.5 * (avg + mx) + alpha * avg + beta * mx
    y = jnp.einsum("oc,bc->bo", params["wc"], f_add[:, :, 0, 0]) + params["bc"]
    a_c = jax.nn.sigmoid(y).reshape(1, -1, 1, 1)
    xr = x * a_c
    m = params["mask"].reshape(1, C, 1, 1)
    f1 = xr * m
    f2 = xr * (1.0 - m)

    def spatial(f):
        fm = f.max(axis=1, keepdims=True)
        fa = f.mean(axis=1, keepdims=True)
        inp = jnp.concatenate([fm, fa], axis=1)
        out = lax.conv_general_dilated(
            inp, params["w2d"], (1, 1), ((3, 3), (3, 3)),
            dimension_numbers=("NCHW", "OIHW", "NCHW"))
        return jax.nn.sigmoid(out)

    return f1 * spatial(f1) + f2 * spatial(f2)


if __name__ == "__main__":
    key = jax.random.PRNGKey(0)
    kx, kp = jax.random.split(key)
    B, C, H, W = 1, 8, 16, 16
    x = jax.random.normal(kx, (B, C, H, W), jnp.float32)
    params = init_params(C, kp)

    out = ham_forward(x, params)
    out = jax.block_until_ready(out)

    ref = ham_reference(x, params)
    np.testing.assert_allclose(np.asarray(out), np.asarray(ref), rtol=1e-4, atol=1e-4)
    print("KERNEL_OK")
</pallas_src>

<mosaic_0001>
module attributes {stable_mosaic.version = 11 : i64} {
  func.func @kernel(%arg0: memref<8x256xf32, #tpu.memory_space<vmem>>, %arg1: memref<8x8xf32, #tpu.memory_space<vmem>>, %arg2: memref<1x8xf32, #tpu.memory_space<vmem>>, %arg3: memref<8x1xf32, #tpu.memory_space<vmem>>, %arg4: memref<8x8xf32, #tpu.memory_space<vmem>>, %arg5: memref<49x4x256xf32, #tpu.memory_space<vmem>>, %arg6: memref<2xf32, #tpu.memory_space<smem>>, %arg7: memref<8x256xf32, #tpu.memory_space<vmem>>) attributes {dimension_semantics = [], scalar_prefetch = 0 : i64, scratch_operands = 0 : i64, tpu.core_type = #tpu.core_type<tc>} {
    %c0 = arith.constant 0 : index
    %c0_0 = arith.constant 0 : index
    %0 = vector.load %arg0[%c0, %c0_0] : memref<8x256xf32, #tpu.memory_space<vmem>>, vector<8x256xf32>
    %c0_1 = arith.constant 0 : index
    %c0_2 = arith.constant 0 : index
    %1 = vector.load %arg1[%c0_1, %c0_2] : memref<8x8xf32, #tpu.memory_space<vmem>>, vector<8x8xf32>
    %c0_3 = arith.constant 0 : index
    %c0_4 = arith.constant 0 : index
    %2 = vector.load %arg2[%c0_3, %c0_4] : memref<1x8xf32, #tpu.memory_space<vmem>>, vector<1x8xf32>
    %c0_5 = arith.constant 0 : index
    %c0_6 = arith.constant 0 : index
    %3 = vector.load %arg3[%c0_5, %c0_6] : memref<8x1xf32, #tpu.memory_space<vmem>>, vector<8x1xf32>
    %c0_7 = arith.constant 0 : index
    %c0_8 = arith.constant 0 : index
    %4 = vector.load %arg4[%c0_7, %c0_8] : memref<8x8xf32, #tpu.memory_space<vmem>>, vector<8x8xf32>
    %c0_9 = arith.constant 0 : index
    %5 = memref.load %arg6[%c0_9] : memref<2xf32, #tpu.memory_space<smem>>
    %c1 = arith.constant 1 : index
    %6 = memref.load %arg6[%c1] : memref<2xf32, #tpu.memory_space<smem>>
    %cst = arith.constant dense<0.000000e+00> : vector<8xf32>
    %7 = vector.multi_reduction <add>, %0, %cst [1] : vector<8x256xf32> to vector<8xf32>
    %8 = vector.shape_cast %7 : vector<8xf32> to vector<8x1xf32>
    %cst_10 = arith.constant 3.906250e-03 : f32
    %9 = vector.broadcast %cst_10 : f32 to vector<8x1xf32>
    %10 = arith.mulf %8, %9 : vector<8x1xf32>
    %cst_11 = arith.constant dense<0xFF800000> : vector<8xf32>
    %11 = vector.multi_reduction <maximumf>, %0, %cst_11 [1] : vector<8x256xf32> to vector<8xf32>
    %12 = vector.shape_cast %11 : vector<8xf32> to vector<8x1xf32>
    %13 = arith.addf %10, %12 : vector<8x1xf32>
    %cst_12 = arith.constant 5.000000e-01 : f32
    %14 = vector.broadcast %cst_12 : f32 to vector<8x1xf32>
    %15 = arith.mulf %14, %13 : vector<8x1xf32>
    %16 = vector.broadcast %5 : f32 to vector<8x1xf32>
    %17 = arith.mulf %16, %10 : vector<8x1xf32>
    %18 = arith.addf %15, %17 : vector<8x1xf32>
    %19 = vector.broadcast %6 : f32 to vector<8x1xf32>
    %20 = arith.mulf %19, %12 : vector<8x1xf32>
    %21 = arith.addf %18, %20 : vector<8x1xf32>
    %22 = vector.broadcast %21 : vector<8x1xf32> to vector<8x8xf32>
    %23 = arith.mulf %1, %22 : vector<8x8xf32>
    %cst_13 = arith.constant dense<0.000000e+00> : vector<8xf32>
    %24 = vector.multi_reduction <add>, %23, %cst_13 [0] : vector<8x8xf32> to vector<8xf32>
    %25 = vector.shape_cast %24 : vector<8xf32> to vector<1x8xf32>
    %26 = arith.addf %25, %2 : vector<1x8xf32>
    %27 = arith.negf %26 : vector<1x8xf32>
    %28 = math.exp %27 : vector<1x8xf32>
    %cst_14 = arith.constant 1.000000e+00 : f32
    %29 = vector.broadcast %cst_14 : f32 to vector<1x8xf32>
    %30 = arith.addf %29, %28 : vector<1x8xf32>
    %31 = arith.divf %29, %30 : vector<1x8xf32>
    %32 = vector.broadcast %31 : vector<1x8xf32> to vector<8x8xf32>
    %33 = arith.mulf %4, %32 : vector<8x8xf32>
    %cst_15 = arith.constant dense<0.000000e+00> : vector<8xf32>
    %34 = vector.multi_reduction <add>, %33, %cst_15 [1] : vector<8x8xf32> to vector<8xf32>
    %35 = vector.shape_cast %34 : vector<8xf32> to vector<8x1xf32>
    %36 = vector.broadcast %35 : vector<8x1xf32> to vector<8x256xf32>
    %37 = arith.mulf %0, %36 : vector<8x256xf32>
    %38 = vector.broadcast %3 : vector<8x1xf32> to vector<8x256xf32>
    %39 = arith.mulf %37, %38 : vector<8x256xf32>
    %40 = arith.subf %37, %39 : vector<8x256xf32>
    %cst_16 = arith.constant dense<0xFF800000> : vector<256xf32>
    %41 = vector.multi_reduction <maximumf>, %39, %cst_16 [0] : vector<8x256xf32> to vector<256xf32>
    %42 = vector.shape_cast %41 : vector<256xf32> to vector<1x256xf32>
    %cst_17 = arith.constant dense<0xFF800000> : vector<256xf32>
    %43 = vector.multi_reduction <maximumf>, %40, %cst_17 [0] : vector<8x256xf32> to vector<256xf32>
    %44 = vector.shape_cast %43 : vector<256xf32> to vector<1x256xf32>
    %cst_18 = arith.constant dense<0.000000e+00> : vector<256xf32>
    %45 = vector.multi_reduction <add>, %39, %cst_18 [0] : vector<8x256xf32> to vector<256xf32>
    %46 = vector.shape_cast %45 : vector<256xf32> to vector<1x256xf32>
    %cst_19 = arith.constant 1.250000e-01 : f32
    %47 = vector.broadcast %cst_19 : f32 to vector<1x256xf32>
    %48 = arith.mulf %46, %47 : vector<1x256xf32>
    %cst_20 = arith.constant dense<0.000000e+00> : vector<256xf32>
    %49 = vector.multi_reduction <add>, %40, %cst_20 [0] : vector<8x256xf32> to vector<256xf32>
    %50 = vector.shape_cast %49 : vector<256xf32> to vector<1x256xf32>
    %cst_21 = arith.constant 1.250000e-01 : f32
    %51 = vector.broadcast %cst_21 : f32 to vector<1x256xf32>
    %52 = arith.mulf %50, %51 : vector<1x256xf32>
    %53 = tpu.concatenate %42, %44, %48, %52 in 0 : vector<1x256xf32>, vector<1x256xf32>, vector<1x256xf32>, vector<1x256xf32> -> vector<4x256xf32>
    %c51_i32 = arith.constant 51 : i32
    %54 = tpu.dynamic_rotate %53 by %c51_i32 dim 1 : vector<4x256xf32>, i32 -> vector<4x256xf32>
    %c0_22 = arith.constant 0 : index
    %c0_23 = arith.constant 0 : index
    %c0_24 = arith.constant 0 : index
    %55 = vector.load %arg5[%c0_22, %c0_23, %c0_24] : memref<49x4x256xf32, #tpu.memory_space<vmem>>, vector<1x4x256xf32>
    %56 = vector.shape_cast %55 : vector<1x4x256xf32> to vector<4x256xf32>
    %57 = arith.mulf %56, %54 : vector<4x256xf32>
    %c50_i32 = arith.constant 50 : i32
    %58 = tpu.dynamic_rotate %53 by %c50_i32 dim 1 : vector<4x256xf32>, i32 -> vector<4x256xf32>
    %c1_25 = arith.constant 1 : index
    %c0_26 = arith.constant 0 : index
    %c0_27 = arith.constant 0 : index
    %59 = vector.load %arg5[%c1_25, %c0_26, %c0_27] : memref<49x4x256xf32, #tpu.memory_space<vmem>>, vector<1x4x256xf32>
    %60 = vector.shape_cast %59 : vector<1x4x256xf32> to vector<4x256xf32>
    %61 = arith.mulf %60, %58 : vector<4x256xf32>
    %c49_i32 = arith.constant 49 : i32
    %62 = tpu.dynamic_rotate %53 by %c49_i32 dim 1 : vector<4x256xf32>, i32 -> vector<4x256xf32>
    %c2 = arith.constant 2 : index
    %c0_28 = arith.constant 0 : index
    %c0_29 = arith.constant 0 : index
    %63 = vector.load %arg5[%c2, %c0_28, %c0_29] : memref<49x4x256xf32, #tpu.memory_space<vmem>>, vector<1x4x256xf32>
    %64 = vector.shape_cast %63 : vector<1x4x256xf32> to vector<4x256xf32>
    %65 = arith.mulf %64, %62 : vector<4x256xf32>
    %c48_i32 = arith.constant 48 : i32
    %66 = tpu.dynamic_rotate %53 by %c48_i32 dim 1 : vector<4x256xf32>, i32 -> vector<4x256xf32>
    %c3 = arith.constant 3 : index
    %c0_30 = arith.constant 0 : index
    %c0_31 = arith.constant 0 : index
    %67 = vector.load %arg5[%c3, %c0_30, %c0_31] : memref<49x4x256xf32, #tpu.memory_space<vmem>>, vector<1x4x256xf32>
    %68 = vector.shape_cast %67 : vector<1x4x256xf32> to vector<4x256xf32>
    %69 = arith.mulf %68, %66 : vector<4x256xf32>
    %c47_i32 = arith.constant 47 : i32
    %70 = tpu.dynamic_rotate %53 by %c47_i32 dim 1 : vector<4x256xf32>, i32 -> vector<4x256xf32>
    %c4 = arith.constant 4 : index
    %c0_32 = arith.constant 0 : index
    %c0_33 = arith.constant 0 : index
    %71 = vector.load %arg5[%c4, %c0_32, %c0_33] : memref<49x4x256xf32, #tpu.memory_space<vmem>>, vector<1x4x256xf32>
    %72 = vector.shape_cast %71 : vector<1x4x256xf32> to vector<4x256xf32>
    %73 = arith.mulf %72, %70 : vector<4x256xf32>
    %74 = arith.addf %57, %73 : vector<4x256xf32>
    %c46_i32 = arith.constant 46 : i32
    %75 = tpu.dynamic_rotate %53 by %c46_i32 dim 1 : vector<4x256xf32>, i32 -> vector<4x256xf32>
    %c5 = arith.constant 5 : index
    %c0_34 = arith.constant 0 : index
    %c0_35 = arith.constant 0 : index
    %76 = vector.load %arg5[%c5, %c0_34, %c0_35] : memref<49x4x256xf32, #tpu.memory_space<vmem>>, vector<1x4x256xf32>
    %77 = vector.shape_cast %76 : vector<1x4x256xf32> to vector<4x256xf32>
    %78 = arith.mulf %77, %75 : vector<4x256xf32>
    %79 = arith.addf %61, %78 : vector<4x256xf32>
    %c45_i32 = arith.constant 45 : i32
    %80 = tpu.dynamic_rotate %53 by %c45_i32 dim 1 : vector<4x256xf32>, i32 -> vector<4x256xf32>
    %c6 = arith.constant 6 : index
    %c0_36 = arith.constant 0 : index
    %c0_37 = arith.constant 0 : index
    %81 = vector.load %arg5[%c6, %c0_36, %c0_37] : memref<49x4x256xf32, #tpu.memory_space<vmem>>, vector<1x4x256xf32>
    %82 = vector.shape_cast %81 : vector<1x4x256xf32> to vector<4x256xf32>
    %83 = arith.mulf %82, %80 : vector<4x256xf32>
    %84 = arith.addf %65, %83 : vector<4x256xf32>
    %c35_i32 = arith.constant 35 : i32
    %85 = tpu.dynamic_rotate %53 by %c35_i32 dim 1 : vector<4x256xf32>, i32 -> vector<4x256xf32>
    %c7 = arith.constant 7 : index
    %c0_38 = arith.constant 0 : index
    %c0_39 = arith.constant 0 : index
    %86 = vector.load %arg5[%c7, %c0_38, %c0_39] : memref<49x4x256xf32, #tpu.memory_space<vmem>>, vector<1x4x256xf32>
    %87 = vector.shape_cast %86 : vector<1x4x256xf32> to vector<4x256xf32>
    %88 = arith.mulf %87, %85 : vector<4x256xf32>
    %89 = arith.addf %69, %88 : vector<4x256xf32>
    %c34_i32 = arith.constant 34 : i32
    %90 = tpu.dynamic_rotate %53 by %c34_i32 dim 1 : vector<4x256xf32>, i32 -> vector<4x256xf32>
    %c8 = arith.constant 8 : index
    %c0_40 = arith.constant 0 : index
    %c0_41 = arith.constant 0 : index
    %91 = vector.load %arg5[%c8, %c0_40, %c0_41] : memref<49x4x256xf32, #tpu.memory_space<vmem>>, vector<1x4x256xf32>
    %92 = vector.shape_cast %91 : vector<1x4x256xf32> to vector<4x256xf32>
    %93 = arith.mulf %92, %90 : vector<4x256xf32>
    %94 = arith.addf %74, %93 : vector<4x256xf32>
    %c33_i32 = arith.constant 33 : i32
    %95 = tpu.dynamic_rotate %53 by %c33_i32 dim 1 : vector<4x256xf32>, i32 -> vector<4x256xf32>
    %c9 = arith.constant 9 : index
    %c0_42 = arith.constant 0 : index
    %c0_43 = arith.constant 0 : index
    %96 = vector.load %arg5[%c9, %c0_42, %c0_43] : memref<49x4x256xf32, #tpu.memory_space<vmem>>, vector<1x4x256xf32>
    %97 = vector.shape_cast %96 : vector<1x4x256xf32> to vector<4x256xf32>
    %98 = arith.mulf %97, %95 : vector<4x256xf32>
    %99 = arith.addf %79, %98 : vector<4x256xf32>
    %c32_i32 = arith.constant 32 : i32
    %100 = tpu.dynamic_rotate %53 by %c32_i32 dim 1 : vector<4x256xf32>, i32 -> vector<4x256xf32>
    %c10 = arith.constant 10 : index
    %c0_44 = arith.constant 0 : index
    %c0_45 = arith.constant 0 : index
    %101 = vector.load %arg5[%c10, %c0_44, %c0_45] : memref<49x4x256xf32, #tpu.memory_space<vmem>>, vector<1x4x256xf32>
    %102 = vector.shape_cast %101 : vector<1x4x256xf32> to vector<4x256xf32>
    %103 = arith.mulf %102, %100 : vector<4x256xf32>
    %104 = arith.addf %84, %103 : vector<4x256xf32>
    %c31_i32 = arith.constant 31 : i32
    %105 = tpu.dynamic_rotate %53 by %c31_i32 dim 1 : vector<4x256xf32>, i32 -> vector<4x256xf32>
    %c11 = arith.constant 11 : index
    %c0_46 = arith.constant 0 : index
    %c0_47 = arith.constant 0 : index
    %106 = vector.load %arg5[%c11, %c0_46, %c0_47] : memref<49x4x256xf32, #tpu.memory_space<vmem>>, vector<1x4x256xf32>
    %107 = vector.shape_cast %106 : vector<1x4x256xf32> to vector<4x256xf32>
    %108 = arith.mulf %107, %105 : vector<4x256xf32>
    %109 = arith.addf %89, %108 : vector<4x256xf32>
    %c30_i32 = arith.constant 30 : i32
    %110 = tpu.dynamic_rotate %53 by %c30_i32 dim 1 : vector<4x256xf32>, i32 -> vector<4x256xf32>
    %c12 = arith.constant 12 : index
    %c0_48 = arith.constant 0 : index
    %c0_49 = arith.constant 0 : index
    %111 = vector.load %arg5[%c12, %c0_48, %c0_49] : memref<49x4x256xf32, #tpu.memory_space<vmem>>, vector<1x4x256xf32>
    %112 = vector.shape_cast %111 : vector<1x4x256xf32> to vector<4x256xf32>
    %113 = arith.mulf %112, %110 : vector<4x256xf32>
    %114 = arith.addf %94, %113 : vector<4x256xf32>
    %c29_i32 = arith.constant 29 : i32
    %115 = tpu.dynamic_rotate %53 by %c29_i32 dim 1 : vector<4x256xf32>, i32 -> vector<4x256xf32>
    %c13 = arith.constant 13 : index
    %c0_50 = arith.constant 0 : index
    %c0_51 = arith.constant 0 : index
    %116 = vector.load %arg5[%c13, %c0_50, %c0_51] : memref<49x4x256xf32, #tpu.memory_space<vmem>>, vector<1x4x256xf32>
    %117 = vector.shape_cast %116 : vector<1x4x256xf32> to vector<4x256xf32>
    %118 = arith.mulf %117, %115 : vector<4x256xf32>
    %119 = arith.addf %99, %118 : vector<4x256xf32>
    %c19_i32 = arith.constant 19 : i32
    %120 = tpu.dynamic_rotate %53 by %c19_i32 dim 1 : vector<4x256xf32>, i32 -> vector<4x256xf32>
    %c14 = arith.constant 14 : index
    %c0_52 = arith.constant 0 : index
    %c0_53 = arith.constant 0 : index
    %121 = vector.load %arg5[%c14, %c0_52, %c0_53] : memref<49x4x256xf32, #tpu.memory_space<vmem>>, vector<1x4x256xf32>
    %122 = vector.shape_cast %121 : vector<1x4x256xf32> to vector<4x256xf32>
    %123 = arith.mulf %122, %120 : vector<4x256xf32>
    %124 = arith.addf %104, %123 : vector<4x256xf32>
    %c18_i32 = arith.constant 18 : i32
    %125 = tpu.dynamic_rotate %53 by %c18_i32 dim 1 : vector<4x256xf32>, i32 -> vector<4x256xf32>
    %c15 = arith.constant 15 : index
    %c0_54 = arith.constant 0 : index
    %c0_55 = arith.constant 0 : index
    %126 = vector.load %arg5[%c15, %c0_54, %c0_55] : memref<49x4x256xf32, #tpu.memory_space<vmem>>, vector<1x4x256xf32>
    %127 = vector.shape_cast %126 : vector<1x4x256xf32> to vector<4x256xf32>
    %128 = arith.mulf %127, %125 : vector<4x256xf32>
    %129 = arith.addf %109, %128 : vector<4x256xf32>
    %c17_i32 = arith.constant 17 : i32
    %130 = tpu.dynamic_rotate %53 by %c17_i32 dim 1 : vector<4x256xf32>, i32 -> vector<4x256xf32>
    %c16 = arith.constant 16 : index
    %c0_56 = arith.constant 0 : index
    %c0_57 = arith.constant 0 : index
    %131 = vector.load %arg5[%c16, %c0_56, %c0_57] : memref<49x4x256xf32, #tpu.memory_space<vmem>>, vector<1x4x256xf32>
    %132 = vector.shape_cast %131 : vector<1x4x256xf32> to vector<4x256xf32>
    %133 = arith.mulf %132, %130 : vector<4x256xf32>
    %134 = arith.addf %114, %133 : vector<4x256xf32>
    %c16_i32 = arith.constant 16 : i32
    %135 = tpu.dynamic_rotate %53 by %c16_i32 dim 1 : vector<4x256xf32>, i32 -> vector<4x256xf32>
    %c17 = arith.constant 17 : index
    %c0_58 = arith.constant 0 : index
    %c0_59 = arith.constant 0 : index
    %136 = vector.load %arg5[%c17, %c0_58, %c0_59] : memref<49x4x256xf32, #tpu.memory_space<vmem>>, vector<1x4x256xf32>
    %137 = vector.shape_cast %136 : vector<1x4x256xf32> to vector<4x256xf32>
    %138 = arith.mulf %137, %135 : vector<4x256xf32>
    %139 = arith.addf %119, %138 : vector<4x256xf32>
    %c15_i32 = arith.constant 15 : i32
    %140 = tpu.dynamic_rotate %53 by %c15_i32 dim 1 : vector<4x256xf32>, i32 -> vector<4x256xf32>
    %c18 = arith.constant 18 : index
    %c0_60 = arith.constant 0 : index
    %c0_61 = arith.constant 0 : index
    %141 = vector.load %arg5[%c18, %c0_60, %c0_61] : memref<49x4x256xf32, #tpu.memory_space<vmem>>, vector<1x4x256xf32>
    %142 = vector.shape_cast %141 : vector<1x4x256xf32> to vector<4x256xf32>
    %143 = arith.mulf %142, %140 : vector<4x256xf32>
    %144 = arith.addf %124, %143 : vector<4x256xf32>
    %c14_i32 = arith.constant 14 : i32
    %145 = tpu.dynamic_rotate %53 by %c14_i32 dim 1 : vector<4x256xf32>, i32 -> vector<4x256xf32>
    %c19 = arith.constant 19 : index
    %c0_62 = arith.constant 0 : index
    %c0_63 = arith.constant 0 : index
    %146 = vector.load %arg5[%c19, %c0_62, %c0_63] : memref<49x4x256xf32, #tpu.memory_space<vmem>>, vector<1x4x256xf32>
    %147 = vector.shape_cast %146 : vector<1x4x256xf32> to vector<4x256xf32>
    %148 = arith.mulf %147, %145 : vector<4x256xf32>
    %149 = arith.addf %129, %148 : vector<4x256xf32>
    %c13_i32 = arith.constant 13 : i32
    %150 = tpu.dynamic_rotate %53 by %c13_i32 dim 1 : vector<4x256xf32>, i32 -> vector<4x256xf32>
    %c20 = arith.constant 20 : index
    %c0_64 = arith.constant 0 : index
    %c0_65 = arith.constant 0 : index
    %151 = vector.load %arg5[%c20, %c0_64, %c0_65] : memref<49x4x256xf32, #tpu.memory_space<vmem>>, vector<1x4x256xf32>
    %152 = vector.shape_cast %151 : vector<1x4x256xf32> to vector<4x256xf32>
    %153 = arith.mulf %152, %150 : vector<4x256xf32>
    %154 = arith.addf %134, %153 : vector<4x256xf32>
    %c3_i32 = arith.constant 3 : i32
    %155 = tpu.dynamic_rotate %53 by %c3_i32 dim 1 : vector<4x256xf32>, i32 -> vector<4x256xf32>
    %c21 = arith.constant 21 : index
    %c0_66 = arith.constant 0 : index
    %c0_67 = arith.constant 0 : index
    %156 = vector.load %arg5[%c21, %c0_66, %c0_67] : memref<49x4x256xf32, #tpu.memory_space<vmem>>, vector<1x4x256xf32>
    %157 = vector.shape_cast %156 : vector<1x4x256xf32> to vector<4x256xf32>
    %158 = arith.mulf %157, %155 : vector<4x256xf32>
    %159 = arith.addf %139, %158 : vector<4x256xf32>
    %c2_i32 = arith.constant 2 : i32
    %160 = tpu.dynamic_rotate %53 by %c2_i32 dim 1 : vector<4x256xf32>, i32 -> vector<4x256xf32>
    %c22 = arith.constant 22 : index
    %c0_68 = arith.constant 0 : index
    %c0_69 = arith.constant 0 : index
    %161 = vector.load %arg5[%c22, %c0_68, %c0_69] : memref<49x4x256xf32, #tpu.memory_space<vmem>>, vector<1x4x256xf32>
    %162 = vector.shape_cast %161 : vector<1x4x256xf32> to vector<4x256xf32>
    %163 = arith.mulf %162, %160 : vector<4x256xf32>
    %164 = arith.addf %144, %163 : vector<4x256xf32>
    %c1_i32 = arith.constant 1 : i32
    %165 = tpu.dynamic_rotate %53 by %c1_i32 dim 1 : vector<4x256xf32>, i32 -> vector<4x256xf32>
    %c23 = arith.constant 23 : index
    %c0_70 = arith.constant 0 : index
    %c0_71 = arith.constant 0 : index
    %166 = vector.load %arg5[%c23, %c0_70, %c0_71] : memref<49x4x256xf32, #tpu.memory_space<vmem>>, vector<1x4x256xf32>
    %167 = vector.shape_cast %166 : vector<1x4x256xf32> to vector<4x256xf32>
    %168 = arith.mulf %167, %165 : vector<4x256xf32>
    %169 = arith.addf %149, %168 : vector<4x256xf32>
    %c24 = arith.constant 24 : index
    %c0_72 = arith.constant 0 : index
    %c0_73 = arith.constant 0 : index
    %170 = vector.load %arg5[%c24, %c0_72, %c0_73] : memref<49x4x256xf32, #tpu.memory_space<vmem>>, vector<1x4x256xf32>
    %171 = vector.shape_cast %170 : vector<1x4x256xf32> to vector<4x256xf32>
    %172 = arith.mulf %171, %53 : vector<4x256xf32>
    %173 = arith.addf %154, %172 : vector<4x256xf32>
    %c255_i32 = arith.constant 255 : i32
    %174 = tpu.dynamic_rotate %53 by %c255_i32 dim 1 : vector<4x256xf32>, i32 -> vector<4x256xf32>
    %c25 = arith.constant 25 : index
    %c0_74 = arith.constant 0 : index
    %c0_75 = arith.constant 0 : index
    %175 = vector.load %arg5[%c25, %c0_74, %c0_75] : memref<49x4x256xf32, #tpu.memory_space<vmem>>, vector<1x4x256xf32>
    %176 = vector.shape_cast %175 : vector<1x4x256xf32> to vector<4x256xf32>
    %177 = arith.mulf %176, %174 : vector<4x256xf32>
    %178 = arith.addf %159, %177 : vector<4x256xf32>
    %c254_i32 = arith.constant 254 : i32
    %179 = tpu.dynamic_rotate %53 by %c254_i32 dim 1 : vector<4x256xf32>, i32 -> vector<4x256xf32>
    %c26 = arith.constant 26 : index
    %c0_76 = arith.constant 0 : index
    %c0_77 = arith.constant 0 : index
    %180 = vector.load %arg5[%c26, %c0_76, %c0_77] : memref<49x4x256xf32, #tpu.memory_space<vmem>>, vector<1x4x256xf32>
    %181 = vector.shape_cast %180 : vector<1x4x256xf32> to vector<4x256xf32>
    %182 = arith.mulf %181, %179 : vector<4x256xf32>
    %183 = arith.addf %164, %182 : vector<4x256xf32>
    %c253_i32 = arith.constant 253 : i32
    %184 = tpu.dynamic_rotate %53 by %c253_i32 dim 1 : vector<4x256xf32>, i32 -> vector<4x256xf32>
    %c27 = arith.constant 27 : index
    %c0_78 = arith.constant 0 : index
    %c0_79 = arith.constant 0 : index
    %185 = vector.load %arg5[%c27, %c0_78, %c0_79] : memref<49x4x256xf32, #tpu.memory_space<vmem>>, vector<1x4x256xf32>
    %186 = vector.shape_cast %185 : vector<1x4x256xf32> to vector<4x256xf32>
    %187 = arith.mulf %186, %184 : vector<4x256xf32>
    %188 = arith.addf %169, %187 : vector<4x256xf32>
    %c243_i32 = arith.constant 243 : i32
    %189 = tpu.dynamic_rotate %53 by %c243_i32 dim 1 : vector<4x256xf32>, i32 -> vector<4x256xf32>
    %c28 = arith.constant 28 : index
    %c0_80 = arith.constant 0 : index
    %c0_81 = arith.constant 0 : index
    %190 = vector.load %arg5[%c28, %c0_80, %c0_81] : memref<49x4x256xf32, #tpu.memory_space<vmem>>, vector<1x4x256xf32>
    %191 = vector.shape_cast %190 : vector<1x4x256xf32> to vector<4x256xf32>
    %192 = arith.mulf %191, %189 : vector<4x256xf32>
    %193 = arith.addf %173, %192 : vector<4x256xf32>
    %c242_i32 = arith.constant 242 : i32
    %194 = tpu.dynamic_rotate %53 by %c242_i32 dim 1 : vector<4x256xf32>, i32 -> vector<4x256xf32>
    %c29 = arith.constant 29 : index
    %c0_82 = arith.constant 0 : index
    %c0_83 = arith.constant 0 : index
    %195 = vector.load %arg5[%c29, %c0_82, %c0_83] : memref<49x4x256xf32, #tpu.memory_space<vmem>>, vector<1x4x256xf32>
    %196 = vector.shape_cast %195 : vector<1x4x256xf32> to vector<4x256xf32>
    %197 = arith.mulf %196, %194 : vector<4x256xf32>
    %198 = arith.addf %178, %197 : vector<4x256xf32>
    %c241_i32 = arith.constant 241 : i32
    %199 = tpu.dynamic_rotate %53 by %c241_i32 dim 1 : vector<4x256xf32>, i32 -> vector<4x256xf32>
    %c30 = arith.constant 30 : index
    %c0_84 = arith.constant 0 : index
    %c0_85 = arith.constant 0 : index
    %200 = vector.load %arg5[%c30, %c0_84, %c0_85] : memref<49x4x256xf32, #tpu.memory_space<vmem>>, vector<1x4x256xf32>
    %201 = vector.shape_cast %200 : vector<1x4x256xf32> to vector<4x256xf32>
    %202 = arith.mulf %201, %199 : vector<4x256xf32>
    %203 = arith.addf %183, %202 : vector<4x256xf32>
    %c240_i32 = arith.constant 240 : i32
    %204 = tpu.dynamic_rotate %53 by %c240_i32 dim 1 : vector<4x256xf32>, i32 -> vector<4x256xf32>
    %c31 = arith.constant 31 : index
    %c0_86 = arith.constant 0 : index
    %c0_87 = arith.constant 0 : index
    %205 = vector.load %arg5[%c31, %c0_86, %c0_87] : memref<49x4x256xf32, #tpu.memory_space<vmem>>, vector<1x4x256xf32>
    %206 = vector.shape_cast %205 : vector<1x4x256xf32> to vector<4x256xf32>
    %207 = arith.mulf %206, %204 : vector<4x256xf32>
    %208 = arith.addf %188, %207 : vector<4x256xf32>
    %c239_i32 = arith.constant 239 : i32
    %209 = tpu.dynamic_rotate %53 by %c239_i32 dim 1 : vector<4x256xf32>, i32 -> vector<4x256xf32>
    %c32 = arith.constant 32 : index
    %c0_88 = arith.constant 0 : index
    %c0_89 = arith.constant 0 : index
    %210 = vector.load %arg5[%c32, %c0_88, %c0_89] : memref<49x4x256xf32, #tpu.memory_space<vmem>>, vector<1x4x256xf32>
    %211 = vector.shape_cast %210 : vector<1x4x256xf32> to vector<4x256xf32>
    %212 = arith.mulf %211, %209 : vector<4x256xf32>
    %213 = arith.addf %193, %212 : vector<4x256xf32>
    %c238_i32 = arith.constant 238 : i32
    %214 = tpu.dynamic_rotate %53 by %c238_i32 dim 1 : vector<4x256xf32>, i32 -> vector<4x256xf32>
    %c33 = arith.constant 33 : index
    %c0_90 = arith.constant 0 : index
    %c0_91 = arith.constant 0 : index
    %215 = vector.load %arg5[%c33, %c0_90, %c0_91] : memref<49x4x256xf32, #tpu.memory_space<vmem>>, vector<1x4x256xf32>
    %216 = vector.shape_cast %215 : vector<1x4x256xf32> to vector<4x256xf32>
    %217 = arith.mulf %216, %214 : vector<4x256xf32>
    %218 = arith.addf %198, %217 : vector<4x256xf32>
    %c237_i32 = arith.constant 237 : i32
    %219 = tpu.dynamic_rotate %53 by %c237_i32 dim 1 : vector<4x256xf32>, i32 -> vector<4x256xf32>
    %c34 = arith.constant 34 : index
    %c0_92 = arith.constant 0 : index
    %c0_93 = arith.constant 0 : index
    %220 = vector.load %arg5[%c34, %c0_92, %c0_93] : memref<49x4x256xf32, #tpu.memory_space<vmem>>, vector<1x4x256xf32>
    %221 = vector.shape_cast %220 : vector<1x4x256xf32> to vector<4x256xf32>
    %222 = arith.mulf %221, %219 : vector<4x256xf32>
    %223 = arith.addf %203, %222 : vector<4x256xf32>
    %c227_i32 = arith.constant 227 : i32
    %224 = tpu.dynamic_rotate %53 by %c227_i32 dim 1 : vector<4x256xf32>, i32 -> vector<4x256xf32>
    %c35 = arith.constant 35 : index
    %c0_94 = arith.constant 0 : index
    %c0_95 = arith.constant 0 : index
    %225 = vector.load %arg5[%c35, %c0_94, %c0_95] : memref<49x4x256xf32, #tpu.memory_space<vmem>>, vector<1x4x256xf32>
    %226 = vector.shape_cast %225 : vector<1x4x256xf32> to vector<4x256xf32>
    %227 = arith.mulf %226, %224 : vector<4x256xf32>
    %228 = arith.addf %208, %227 : vector<4x256xf32>
    %c226_i32 = arith.constant 226 : i32
    %229 = tpu.dynamic_rotate %53 by %c226_i32 dim 1 : vector<4x256xf32>, i32 -> vector<4x256xf32>
    %c36 = arith.constant 36 : index
    %c0_96 = arith.constant 0 : index
    %c0_97 = arith.constant 0 : index
    %230 = vector.load %arg5[%c36, %c0_96, %c0_97] : memref<49x4x256xf32, #tpu.memory_space<vmem>>, vector<1x4x256xf32>
    %231 = vector.shape_cast %230 : vector<1x4x256xf32> to vector<4x256xf32>
    %232 = arith.mulf %231, %229 : vector<4x256xf32>
    %233 = arith.addf %213, %232 : vector<4x256xf32>
    %c225_i32 = arith.constant 225 : i32
    %234 = tpu.dynamic_rotate %53 by %c225_i32 dim 1 : vector<4x256xf32>, i32 -> vector<4x256xf32>
    %c37 = arith.constant 37 : index
    %c0_98 = arith.constant 0 : index
    %c0_99 = arith.constant 0 : index
    %235 = vector.load %arg5[%c37, %c0_98, %c0_99] : memref<49x4x256xf32, #tpu.memory_space<vmem>>, vector<1x4x256xf32>
    %236 = vector.shape_cast %235 : vector<1x4x256xf32> to vector<4x256xf32>
    %237 = arith.mulf %236, %234 : vector<4x256xf32>
    %238 = arith.addf %218, %237 : vector<4x256xf32>
    %c224_i32 = arith.constant 224 : i32
    %239 = tpu.dynamic_rotate %53 by %c224_i32 dim 1 : vector<4x256xf32>, i32 -> vector<4x256xf32>
    %c38 = arith.constant 38 : index
    %c0_100 = arith.constant 0 : index
    %c0_101 = arith.constant 0 : index
    %240 = vector.load %arg5[%c38, %c0_100, %c0_101] : memref<49x4x256xf32, #tpu.memory_space<vmem>>, vector<1x4x256xf32>
    %241 = vector.shape_cast %240 : vector<1x4x256xf32> to vector<4x256xf32>
    %242 = arith.mulf %241, %239 : vector<4x256xf32>
    %243 = arith.addf %223, %242 : vector<4x256xf32>
    %c223_i32 = arith.constant 223 : i32
    %244 = tpu.dynamic_rotate %53 by %c223_i32 dim 1 : vector<4x256xf32>, i32 -> vector<4x256xf32>
    %c39 = arith.constant 39 : index
    %c0_102 = arith.constant 0 : index
    %c0_103 = arith.constant 0 : index
    %245 = vector.load %arg5[%c39, %c0_102, %c0_103] : memref<49x4x256xf32, #tpu.memory_space<vmem>>, vector<1x4x256xf32>
    %246 = vector.shape_cast %245 : vector<1x4x256xf32> to vector<4x256xf32>
    %247 = arith.mulf %246, %244 : vector<4x256xf32>
    %248 = arith.addf %228, %247 : vector<4x256xf32>
    %c222_i32 = arith.constant 222 : i32
    %249 = tpu.dynamic_rotate %53 by %c222_i32 dim 1 : vector<4x256xf32>, i32 -> vector<4x256xf32>
    %c40 = arith.constant 40 : index
    %c0_104 = arith.constant 0 : index
    %c0_105 = arith.constant 0 : index
    %250 = vector.load %arg5[%c40, %c0_104, %c0_105] : memref<49x4x256xf32, #tpu.memory_space<vmem>>, vector<1x4x256xf32>
    %251 = vector.shape_cast %250 : vector<1x4x256xf32> to vector<4x256xf32>
    %252 = arith.mulf %251, %249 : vector<4x256xf32>
    %253 = arith.addf %233, %252 : vector<4x256xf32>
    %c221_i32 = arith.constant 221 : i32
    %254 = tpu.dynamic_rotate %53 by %c221_i32 dim 1 : vector<4x256xf32>, i32 -> vector<4x256xf32>
    %c41 = arith.constant 41 : index
    %c0_106 = arith.constant 0 : index
    %c0_107 = arith.constant 0 : index
    %255 = vector.load %arg5[%c41, %c0_106, %c0_107] : memref<49x4x256xf32, #tpu.memory_space<vmem>>, vector<1x4x256xf32>
    %256 = vector.shape_cast %255 : vector<1x4x256xf32> to vector<4x256xf32>
    %257 = arith.mulf %256, %254 : vector<4x256xf32>
    %258 = arith.addf %238, %257 : vector<4x256xf32>
    %c211_i32 = arith.constant 211 : i32
    %259 = tpu.dynamic_rotate %53 by %c211_i32 dim 1 : vector<4x256xf32>, i32 -> vector<4x256xf32>
    %c42 = arith.constant 42 : index
    %c0_108 = arith.constant 0 : index
    %c0_109 = arith.constant 0 : index
    %260 = vector.load %arg5[%c42, %c0_108, %c0_109] : memref<49x4x256xf32, #tpu.memory_space<vmem>>, vector<1x4x256xf32>
    %261 = vector.shape_cast %260 : vector<1x4x256xf32> to vector<4x256xf32>
    %262 = arith.mulf %261, %259 : vector<4x256xf32>
    %263 = arith.addf %243, %262 : vector<4x256xf32>
    %c210_i32 = arith.constant 210 : i32
    %264 = tpu.dynamic_rotate %53 by %c210_i32 dim 1 : vector<4x256xf32>, i32 -> vector<4x256xf32>
    %c43 = arith.constant 43 : index
    %c0_110 = arith.constant 0 : index
    %c0_111 = arith.constant 0 : index
    %265 = vector.load %arg5[%c43, %c0_110, %c0_111] : memref<49x4x256xf32, #tpu.memory_space<vmem>>, vector<1x4x256xf32>
    %266 = vector.shape_cast %265 : vector<1x4x256xf32> to vector<4x256xf32>
    %267 = arith.mulf %266, %264 : vector<4x256xf32>
    %268 = arith.addf %248, %267 : vector<4x256xf32>
    %c209_i32 = arith.constant 209 : i32
    %269 = tpu.dynamic_rotate %53 by %c209_i32 dim 1 : vector<4x256xf32>, i32 -> vector<4x256xf32>
    %c44 = arith.constant 44 : index
    %c0_112 = arith.constant 0 : index
    %c0_113 = arith.constant 0 : index
    %270 = vector.load %arg5[%c44, %c0_112, %c0_113] : memref<49x4x256xf32, #tpu.memory_space<vmem>>, vector<1x4x256xf32>
    %271 = vector.shape_cast %270 : vector<1x4x256xf32> to vector<4x256xf32>
    %272 = arith.mulf %271, %269 : vector<4x256xf32>
    %273 = arith.addf %253, %272 : vector<4x256xf32>
    %c208_i32 = arith.constant 208 : i32
    %274 = tpu.dynamic_rotate %53 by %c208_i32 dim 1 : vector<4x256xf32>, i32 -> vector<4x256xf32>
    %c45 = arith.constant 45 : index
    %c0_114 = arith.constant 0 : index
    %c0_115 = arith.constant 0 : index
    %275 = vector.load %arg5[%c45, %c0_114, %c0_115] : memref<49x4x256xf32, #tpu.memory_space<vmem>>, vector<1x4x256xf32>
    %276 = vector.shape_cast %275 : vector<1x4x256xf32> to vector<4x256xf32>
    %277 = arith.mulf %276, %274 : vector<4x256xf32>
    %278 = arith.addf %258, %277 : vector<4x256xf32>
    %c207_i32 = arith.constant 207 : i32
    %279 = tpu.dynamic_rotate %53 by %c207_i32 dim 1 : vector<4x256xf32>, i32 -> vector<4x256xf32>
    %c46 = arith.constant 46 : index
    %c0_116 = arith.constant 0 : index
    %c0_117 = arith.constant 0 : index
    %280 = vector.load %arg5[%c46, %c0_116, %c0_117] : memref<49x4x256xf32, #tpu.memory_space<vmem>>, vector<1x4x256xf32>
    %281 = vector.shape_cast %280 : vector<1x4x256xf32> to vector<4x256xf32>
    %282 = arith.mulf %281, %279 : vector<4x256xf32>
    %283 = arith.addf %263, %282 : vector<4x256xf32>
    %c206_i32 = arith.constant 206 : i32
    %284 = tpu.dynamic_rotate %53 by %c206_i32 dim 1 : vector<4x256xf32>, i32 -> vector<4x256xf32>
    %c47 = arith.constant 47 : index
    %c0_118 = arith.constant 0 : index
    %c0_119 = arith.constant 0 : index
    %285 = vector.load %arg5[%c47, %c0_118, %c0_119] : memref<49x4x256xf32, #tpu.memory_space<vmem>>, vector<1x4x256xf32>
    %286 = vector.shape_cast %285 : vector<1x4x256xf32> to vector<4x256xf32>
    %287 = arith.mulf %286, %284 : vector<4x256xf32>
    %288 = arith.addf %268, %287 : vector<4x256xf32>
    %c205_i32 = arith.constant 205 : i32
    %289 = tpu.dynamic_rotate %53 by %c205_i32 dim 1 : vector<4x256xf32>, i32 -> vector<4x256xf32>
    %c48 = arith.constant 48 : index
    %c0_120 = arith.constant 0 : index
    %c0_121 = arith.constant 0 : index
    %290 = vector.load %arg5[%c48, %c0_120, %c0_121] : memref<49x4x256xf32, #tpu.memory_space<vmem>>, vector<1x4x256xf32>
    %291 = vector.shape_cast %290 : vector<1x4x256xf32> to vector<4x256xf32>
    %292 = arith.mulf %291, %289 : vector<4x256xf32>
    %293 = arith.addf %273, %292 : vector<4x256xf32>
    %294 = arith.addf %293, %278 : vector<4x256xf32>
    %295 = arith.addf %283, %288 : vector<4x256xf32>
    %296 = arith.addf %294, %295 : vector<4x256xf32>
    %297 = vector.extract_strided_slice %296 {offsets = [0, 0], sizes = [2, 256], strides = [1, 1]} : vector<4x256xf32> to vector<2x256xf32>
    %298 = vector.extract_strided_slice %296 {offsets = [2, 0], sizes = [2, 256], strides = [1, 1]} : vector<4x256xf32> to vector<2x256xf32>
    %299 = arith.addf %297, %298 : vector<2x256xf32>
    %300 = arith.negf %299 : vector<2x256xf32>
    %301 = math.exp %300 : vector<2x256xf32>
    %cst_122 = arith.constant 1.000000e+00 : f32
    %302 = vector.broadcast %cst_122 : f32 to vector<2x256xf32>
    %303 = arith.addf %302, %301 : vector<2x256xf32>
    %304 = arith.divf %302, %303 : vector<2x256xf32>
    %305 = vector.extract_strided_slice %304 {offsets = [0, 0], sizes = [1, 256], strides = [1, 1]} : vector<2x256xf32> to vector<1x256xf32>
    %306 = vector.extract_strided_slice %304 {offsets = [1, 0], sizes = [1, 256], strides = [1, 1]} : vector<2x256xf32> to vector<1x256xf32>
    %cst_123 = arith.constant 5.000000e-01 : f32
    %307 = vector.broadcast %cst_123 : f32 to vector<8x1xf32>
    %308 = arith.cmpf ogt, %3, %307 : vector<8x1xf32>
    %309 = vector.shape_cast %308 : vector<8x1xi1> to vector<8x1xi1>
    %310 = vector.broadcast %309 : vector<8x1xi1> to vector<8x256xi1>
    %311 = vector.shape_cast %305 : vector<1x256xf32> to vector<1x256xf32>
    %312 = vector.broadcast %311 : vector<1x256xf32> to vector<8x256xf32>
    %313 = vector.shape_cast %306 : vector<1x256xf32> to vector<1x256xf32>
    %314 = vector.broadcast %313 : vector<1x256xf32> to vector<8x256xf32>
    %315 = arith.select %310, %312, %314 : vector<8x256xi1>, vector<8x256xf32>
    %316 = arith.mulf %37, %315 : vector<8x256xf32>
    %c0_124 = arith.constant 0 : index
    %c0_125 = arith.constant 0 : index
    %317 = vector.load %arg7[%c0_124, %c0_125] : memref<8x256xf32, #tpu.memory_space<vmem>>, vector<8x256xf32>
    tpu.vector_store %arg7[%c0_124, %c0_125], %316 {strides = array<i32>} : memref<8x256xf32, #tpu.memory_space<vmem>>, vector<8x256xf32>,
    return
  }
}

</mosaic_0001>

<bundles_post_ra>
// kernel: tpu_custom_call.1
= control target key start
LH: loop header
LB: loop body
LE: loop exit
PB: predicated region body
PF: predicated region fallthrough
CT: control target
= control target key end

     0   :  { %12 = vsyncpa [#allocation3], 0  ;;  %s1476_s0 = inlined_call_operand.hbm [shape: f32[8,256], index: 0, kind: input, shape index: {}]   ;;  %s1477_s1 = inlined_call_operand.vmem [shape: f32[8,8], index: 1, kind: input, shape index: {}]   ;;  %s1478_s2 = inlined_call_operand.hbm [shape: f32[1,8], index: 2, kind: input, shape index: {}]   ;;  %s1479_s3 = inlined_call_operand.vmem [shape: f32[8,1], index: 3, kind: input, shape index: {}]   ;;  %s1480_s4 = inlined_call_operand.vmem [shape: f32[8,8], index: 4, kind: input, shape index: {}]   ;;  %s1481_s5 = inlined_call_operand.hbm [shape: f32[49,4,256], index: 5, kind: input, shape index: {}]   ;;  %s1482_s6 = inlined_call_operand.vmem [shape: f32[2], index: 6, kind: input, shape index: {}]   ;;  %s1483_s7 = inlined_call_operand.hbm [shape: f32[8,256], index: 7, kind: output, shape index: {}]  }
   0x1   :  { %13 = vsyncpa [#allocation7], 0 }
   0x2   :  { %14 = vsyncpa [#allocation5], 0 }
   0x3   :  { %15 = vsyncpa [#allocation4], 0  ;;  %s1171_s24 = smov [#allocation6]   ;;  %s1172_s26 = smov [#allocation2]  }
   0x4   :  { %s34_s25 = sshll.u32 %s1171_s24, 4  ;;  %s22_s27 = sshll.u32 %s1172_s26, 4  ;;  %s35_s25 = int_to_ptr.vmem [resolvable:$true] %s34_s25  ;;  %s23_s27 = int_to_ptr.vmem [resolvable:$true] %s22_s27 }
   0x5   :  { %s1079_s28 = scalar_lea.vmem %s35_s25, 16  ;;  %s1083_s29 = scalar_lea.vmem %s35_s25, 32 }
   0x6   :  { %p1080_p0 = scmp.ne.s32.totalorder %s35_s25, %s1079_s28  ;;  %p1084_p1 = scmp.lt.s32.totalorder %s35_s25, %s35_s25 }
   0x7   :  { %p1085_p2 = scmp.lt.s32.totalorder %s1083_s29, %s1079_s28 }
   0x9   :  { %p1086_p3 = por %p1085_p2, %p1084_p1 }
   0xb   :  { %p1087_p4 = pnand %p1086_p3, %p1080_p0 }
   0xd   :  { %1090 = shalt.err (!%p1087_p4)
}
   0xe   :  { %37 = dma.hbm_to_vmem [thread:$0]  %s1478_s2, 16, %s35_s25, [#allocation7]  }
   0xf   :  { %s1099_s9 = scalar_lea.vmem %s23_s27, 256  ;;  %p1104_p6 = scmp.lt.s32.totalorder %s23_s27, %s23_s27 }
  0x10   :  { %p1100_p5 = scmp.ne.s32.totalorder %s23_s27, %s1099_s9  ;;  %p1105_p7 = scmp.lt.s32.totalorder %s1099_s9, %s1099_s9 }
  0x12   :  { %p1106_p8 = por %p1105_p7, %p1104_p6 }
  0x14   :  { %p1107_p9 = pnand %p1106_p8, %p1100_p5 }
  0x16   :  { %1110 = shalt.err (!%p1107_p9)
}
  0x17   :  { %25 = dma.hbm_to_vmem [thread:$0]  %s1476_s0, 256, %s23_s27, [#allocation3]  }
  0x18   :  { %s1173_s12 = smov [#allocation8]   ;;  %s60_s16 = sshll.u32 %s1482_s6, 4  ;;  %s61_s16 = int_to_ptr.vmem [resolvable:$true] %s60_s16 }
  0x19   :  { %s47_s13 = sshll.u32 %s1173_s12, 4  ;;  %s48_s13 = int_to_ptr.vmem [resolvable:$true] %s47_s13 }
  0x1a   :  { %s1119_s17 = scalar_lea.vmem %s48_s13, 6272  ;;  %p1124_p11 = scmp.lt.s32.totalorder %s48_s13, %s48_s13 }
  0x1b   :  { %p1120_p10 = scmp.ne.s32.totalorder %s48_s13, %s1119_s17  ;;  %p1125_p12 = scmp.lt.s32.totalorder %s1119_s17, %s1119_s17 }
  0x1d   :  { %p1126_p13 = por %p1125_p12, %p1124_p11 }
  0x1f   :  { %p1127_p0 = pnand %p1126_p13, %p1120_p10 }
  0x21   :  { %1130 = shalt.err (!%p1127_p0)
}
  0x22   :  { %s1174_s2 = smov 128   ;;  %s1175_s18 = smov 8  }
  0x23   :  { %53 = dma.hbm_to_vmem [thread:$0]  %s1481_s5, 6272, %s48_s13, [#allocation7], %s1174_s2, %s1174_s2, %s1175_s18  }
  0x24   :  { %s1131_s0 = scalar_lea.vmem %s61_s16, 16  ;;  %p1136_p2 = scmp.lt.s32.totalorder %s61_s16, %s61_s16 }
  0x25   :  { %p1132_p1 = scmp.ne.s32.totalorder %s61_s16, %s1131_s0  ;;  %p1137_p3 = scmp.lt.s32.totalorder %s1131_s0, %s1131_s0 }
  0x27   :  { %p1138_p4 = por %p1137_p3, %p1136_p2 }
  0x29   :  { %p1139_p5 = pnand %p1138_p4, %p1132_p1 }
  0x2b   :  { %1142 = shalt.err (!%p1139_p5)
}
  0x2c   :  { %s1176_s6 = smov [#allocation9]  }
  0x2d   :  { %63 = dma.vmem_to_smem %s61_s16, 16, %s1176_s6, [#allocation5]  }
  0x2e   :  { %1163 = dma.done.wait [#allocation3], 256  }
  0x2f   :  { %1164 = vsyncadd [#allocation3], 4294967040 }
  0x30   :  { %1165 = dma.done.wait [#allocation7], 6288  }
  0x31   :  { %1166 = vsyncadd [#allocation7], 4294961008 }
  0x32   :  { %1167 = dma.done.wait [#allocation5], 16  }
  0x33   :  { %1168 = vsyncadd [#allocation5], 4294967280 }
  0x34   :  { %76 = sfence }
  0x35   :  { %v77_v0 = vld [vmem:[#allocation2] sm:$0xff]  ;;  %v78_v1 = vld [vmem:[#allocation2 + $0x8] sm:$0xff]  ;;  %v1177_v5 = vmov 0   ;;  %s83_s22 = sld [smem:[#allocation9]]  ;;  %vm101_vm1 = vcmask 64512   ;;  %v116_v32 = vlaneseq  ;;  %vm187_vm2 = vcmask 1040384  }
  0x36   :  { %v85_v2 = vadd.f32 %v78_v1, %v77_v0  ;;  %v89_v3 = vmax.f32 %v77_v0, %v78_v1  ;;  %v81_v4 = vld [vmem:[%s1479_s3] sm:$0xff]  ;;  %1061 = vset.pattern.permute.xlu1 %v1177_v5  ;;  %1062 = vset.pattern.permute.xlu0 %v1177_v5  ;;  %s1001_s23 = sld [smem:[#allocation9 + $0x1]]  ;;  %v80_v26 = vld [vmem:[#allocation6] sm:$0x1]  ;;  %vm190_vm3 = vcmask 1041408   ;;  %vm193_vm4 = vcmask 1042432  }
  0x37   :  { %vm935_vm0 = vcmp.gt.f32.partialorder %v81_v4, 0.5  ;;  %128 = vperm.xlu1 %1061, %v81_v4   ;;  %v79_v17 = vld [vmem:[%s1477_s1] sm:$0xff]  ;;  %v1289_v33 = vshrl.u32 %v116_v32, 7  ;;  %s1179_s26 = smov 50   ;;  %s1180_s27 = smov 49  }
  0x38   :  { %86 = vadd.xlane.f32.xlu0 %v85_v2  ;;  %v1282_v6 = vsel %vm935_vm0, 1, %v1177_v5  ;;  %v82_v36 = vld [vmem:[%s1480_s4] sm:$0xff]  ;;  %s1178_s4 = smov 51   ;;  %s1181_s28 = smov 48  }
  0x39   :  { %v1292_v34 = vsub.s32 0, %v1289_v33  ;;  %s1182_s29 = smov 47   ;;  %s1183_s30 = smov 46  }
  0x3a   :  { %s1184_s8 = smov 45   ;;  %s1185_s9 = smov 35  }
  0x3b   :  { %v94_v9 = vstv %s83_s22  ;;  %s1186_s10 = smov 34   ;;  %s1187_s11 = smov 33  }
  0x3c   :  { %90 = vmax.xlane.f32.xlu0 %v89_v3  ;;  %v97_v12 = vstv %s1001_s23  ;;  %s1188_s12 = smov 32   ;;  %s1189_s13 = smov 31  }
  0x3d   :  { %s1190_s14 = smov 30   ;;  %s1191_s15 = smov 29  }
  0x3e   :  { %s1192_s16 = smov 19   ;;  %s1193_s17 = smov 18  }
  0x3f   :  { %s1194_s2 = smov 17   ;;  %s1195_s18 = smov 16  }
  0x40   :  { %s1196_s19 = smov 15   ;;  %s1197_s20 = smov 14  }
  0x41   :  { %s1198_s0 = smov 13   ;;  %s1199_s6 = smov 3  }
  0x42   :  { %s1200_s5 = smov 2   ;;  %s1201_s21 = smov 1  }
  0x43   :  { %s1202_s22 = smov 127   ;;  %s1203_s23 = smov 126  }
  0x44   :  { %s1204_s3 = smov 125   ;;  %s1205_s24 = smov 115  }
  0x45   :  { %s1206_s1 = smov 114   ;;  %s1207_s25 = smov 113  }
  0xb2   :  { %v129_v40 = vpop.permute.xlu1 %128 }
  0xc1   :  { %v87_v7 = vpop.xlane.xlu0 %86 }
  0xc2   :  { %v88_v8 = vmul.f32 0.00390625, %v87_v7 }
  0xc4   :  { %v95_v13 = vmul.f32 %v94_v9, %v88_v8 }
  0xc5   :  { %v91_v10 = vpop.xlane.xlu0 %90 }
  0xc6   :  { %v92_v11 = vadd.f32 %v91_v10, %v88_v8  ;;  %v98_v16 = vmul.f32 %v97_v12, %v91_v10 }
  0xc8   :  { %v93_v14 = vmul.f32 0.5, %v92_v11 }
  0xca   :  { %v96_v15 = vadd.f32 %v95_v13, %v93_v14 }
  0xcc   :  { %v99_v18 = vadd.f32 %v98_v16, %v96_v15 }
  0xce   :  { %v100_v19 = vmul.f32 %v99_v18, %v79_v17 }
  0xd0   :  { %v102_v20 = vsel %vm101_vm1, %v100_v19, 0.0 }
  0xd1   :  { %v103_v21 = vrot.slane %v102_v20, 4 }
  0xd3   :  { %v104_v22 = vadd.f32 %v103_v21, %v102_v20 }
  0xd5   :  { %v105_v23 = vrot.slane %v104_v22, 2 }
  0xd7   :  { %v106_v24 = vadd.f32 %v105_v23, %v104_v22 }
  0xd9   :  { %v107_v25 = vrot.slane %v106_v24, 1 }
  0xdb   :  { %v108_v27 = vadd.f32 %v107_v25, %v106_v24 }
  0xdd   :  { %v109_v28 = vadd.f32 %v108_v27, %v80_v26 }
  0xdf   :  { %v1002_v29 = vmul.f32 -1.442695, %v109_v28 }
  0xe1   :  { %1063 = vpow2.f32 %v1002_v29 }
  0xee   :  { %v1064_v30 = vpop.eup %1063 }
  0xef   :  { %v113_v31 = vadd.f32 1.0, %v1064_v30 }
  0xf1   :  { %1065 = vrcp.f32 %v113_v31 }
  0xfe   :  { %v1066_v35 = vpop.eup %1065 }
  0xff   :  { %v119_v37 = vrot.slane %v1066_v35, %v1292_v34 }
 0x101   :  { %v120_v38 = vmul.f32 %v119_v37, %v82_v36 }
 0x103   :  { %v121_v39 = vsel %vm101_vm1, %v120_v38, 0.0 }
 0x104   :  { %122 = vadd.xlane.f32.xlu1 %v121_v39 }
 0x18d   :  { %v123_v41 = vpop.xlane.xlu1 %122 }
 0x18e   :  { %v1299_v42 = vmul.f32 %v123_v41, %v77_v0  ;;  %v1301_v43 = vmul.f32 %v123_v41, %v78_v1 }
 0x190   :  { %v131_v44 = vmul.f32 %v129_v40, %v1299_v42  ;;  %v132_v45 = vmul.f32 %v129_v40, %v1301_v43 }
 0x192   :  { %v133_v46 = vsub.f32 %v1299_v42, %v131_v44  ;;  %v134_v47 = vsub.f32 %v1301_v43, %v132_v45  ;;  %v135_v48 = vrot.slane %v131_v44, 4  ;;  %v141_v49 = vrot.slane %v132_v45, 4 }
 0x194   :  { %v136_v50 = vmax.f32 %v131_v44, %v135_v48  ;;  %v142_v51 = vmax.f32 %v132_v45, %v141_v49  ;;  %v147_v52 = vrot.slane %v133_v46, 4  ;;  %v153_v53 = vrot.slane %v134_v47, 4 }
 0x195   :  { %v160_v54 = vadd.f32 %v135_v48, %v131_v44  ;;  %v166_v55 = vadd.f32 %v141_v49, %v132_v45  ;;  %v1370_v44 = vand.u32 127, %v116_v32 }
 0x196   :  { %v137_v56 = vrot.slane %v136_v50, 2  ;;  %v143_v57 = vrot.slane %v142_v51, 2  ;;  %v148_v58 = vmax.f32 %v133_v46, %v147_v52  ;;  %v154_v59 = vmax.f32 %v134_v47, %v153_v53 }
 0x197   :  { %v161_v60 = vrot.slane %v160_v54, 2  ;;  %v167_v61 = vrot.slane %v166_v55, 2  ;;  %v174_v62 = vadd.f32 %v147_v52, %v133_v46  ;;  %v180_v63 = vadd.f32 %v153_v53, %v134_v47 }
 0x198   :  { %v138_v0 = vmax.f32 %v136_v50, %v137_v56  ;;  %v144_v1 = vmax.f32 %v142_v51, %v143_v57  ;;  %v149_v2 = vrot.slane %v148_v58, 2  ;;  %v155_v3 = vrot.slane %v154_v59, 2 }
 0x199   :  { %v162_v4 = vadd.f32 %v161_v60, %v160_v54  ;;  %v168_v5 = vadd.f32 %v167_v61, %v166_v55  ;;  %v175_v7 = vrot.slane %v174_v62, 2  ;;  %v181_v8 = vrot.slane %v180_v63, 2 }
 0x19a   :  { %v139_v9 = vrot.slane %v138_v0, 1  ;;  %v145_v10 = vrot.slane %v144_v1, 1  ;;  %v150_v11 = vmax.f32 %v148_v58, %v149_v2  ;;  %v156_v12 = vmax.f32 %v154_v59, %v155_v3 }
 0x19b   :  { %v163_v13 = vrot.slane %v162_v4, 1  ;;  %v169_v14 = vrot.slane %v168_v5, 1  ;;  %v176_v15 = vadd.f32 %v175_v7, %v174_v62  ;;  %v182_v16 = vadd.f32 %v181_v8, %v180_v63 }
 0x19c   :  { %v151_v17 = vrot.slane %v150_v11, 1  ;;  %v157_v18 = vrot.slane %v156_v12, 1  ;;  %v140_v23 = vmax.f32 %v138_v0, %v139_v9  ;;  %v146_v24 = vmax.f32 %v144_v1, %v145_v10 }
 0x19d   :  { %v164_v19 = vadd.f32 %v163_v13, %v162_v4  ;;  %v170_v20 = vadd.f32 %v169_v14, %v168_v5  ;;  %v177_v21 = vrot.slane %v176_v15, 1  ;;  %v183_v22 = vrot.slane %v182_v16, 1  ;;  %v205_v4 = vld [vmem:[#allocation8] sm:$0xff]  ;;  %v219_v14 = vld [vmem:[#allocation8 + $0x8] sm:$0xff] }
 0x19e   :  { %v152_v25 = vmax.f32 %v150_v11, %v151_v17  ;;  %v158_v26 = vmax.f32 %v156_v12, %v157_v18  ;;  %vm202_vm5 = vcmp.lt.s32.totalorder %v1370_v44, 51  ;;  %vm215_vm6 = vcmp.lt.s32.totalorder %v1370_v44, 50  ;;  %v261_v5 = vld [vmem:[#allocation8 + $0x20] sm:$0xff] }
 0x19f   :  { %v171_v27 = vmul.f32 0.125, %v164_v19  ;;  %v172_v28 = vmul.f32 0.125, %v170_v20  ;;  %v178_v29 = vadd.f32 %v177_v21, %v176_v15  ;;  %v184_v30 = vadd.f32 %v183_v22, %v182_v16  ;;  %v276_v15 = vld [vmem:[#allocation8 + $0x28] sm:$0xff] }
 0x1a0   :  { %v188_v31 = vsel %vm187_vm2, %v140_v23, %v152_v25  ;;  %v189_v35 = vsel %vm187_vm2, %v146_v24, %v158_v26  ;;  %vm229_vm7 = vcmp.lt.s32.totalorder %v1370_v44, 49  ;;  %vm243_vm8 = vcmp.lt.s32.totalorder %v1370_v44, 48  ;;  %v233_v24 = vld [vmem:[#allocation8 + $0x10] sm:$0xff] }
 0x1a1   :  { %v185_v36 = vmul.f32 0.125, %v178_v29  ;;  %v186_v37 = vmul.f32 0.125, %v184_v30  ;;  %v191_v38 = vsel %vm190_vm3, %v188_v31, %v171_v27  ;;  %v192_v39 = vsel %vm190_vm3, %v189_v35, %v172_v28  ;;  %v291_v25 = vld [vmem:[#allocation8 + $0x30] sm:$0xff] }
 0x1a2   :  { %vm257_vm9 = vcmp.lt.s32.totalorder %v1370_v44, 47  ;;  %vm272_vm10 = vcmp.lt.s32.totalorder %v1370_v44, 46  ;;  %vm287_vm11 = vcmp.lt.s32.totalorder %v1370_v44, 45  ;;  %vm302_vm12 = vcmp.lt.s32.totalorder %v1370_v44, 35 }
 0x1a3   :  { %v1311_v40 = vsel %vm193_vm4, %v191_v38, %v185_v36  ;;  %v1313_v41 = vsel %vm193_vm4, %v192_v39, %v186_v37  ;;  %v247_v37 = vld [vmem:[#allocation8 + $0x18] sm:$0xff]  ;;  %vm317_vm13 = vcmp.lt.s32.totalorder %v1370_v44, 34  ;;  %vm332_vm14 = vcmp.lt.s32.totalorder %v1370_v44, 33 }
 0x1a4   :  { %198 = vrot.lane.b32.xlu1 %v1313_v41, %s1178_s4  ;;  %196 = vrot.lane.b32.xlu0 %v1311_v40, %s1178_s4  ;;  %s1208_s4 = smov 112   ;;  %v306_v38 = vld [vmem:[#allocation8 + $0x38] sm:$0xff]  ;;  %vm347_vm15 = vcmp.lt.s32.totalorder %v1370_v44, 32  ;;  %vm362_vm0 = vcmp.lt.s32.totalorder %v1370_v44, 31  ;;  %vm377_vm1 = vcmp.lt.s32.totalorder %v1370_v44, 30  ;;  %vm392_vm2 = vcmp.lt.s32.totalorder %v1370_v44, 29 }
 0x1a5   :  { %vm407_vm3 = vcmp.lt.s32.totalorder %v1370_v44, 19  ;;  %vm422_vm4 = vcmp.lt.s32.totalorder %v1370_v44, 18 }
 0x1a8   :  { %211 = vrot.lane.b32.xlu1 %v1311_v40, %s1179_s26  ;;  %225 = vrot.lane.b32.xlu0 %v1311_v40, %s1180_s27 }
 0x1ac   :  { %213 = vrot.lane.b32.xlu1 %v1313_v41, %s1179_s26  ;;  %239 = vrot.lane.b32.xlu0 %v1311_v40, %s1181_s28  ;;  %s1209_s26 = smov 111  }
 0x1b0   :  { %227 = vrot.lane.b32.xlu1 %v1313_v41, %s1180_s27  ;;  %253 = vrot.lane.b32.xlu0 %v1311_v40, %s1182_s29  ;;  %s1210_s27 = smov 110  }
 0x1b4   :  { %241 = vrot.lane.b32.xlu1 %v1313_v41, %s1181_s28  ;;  %268 = vrot.lane.b32.xlu0 %v1311_v40, %s1183_s30  ;;  %s1211_s28 = smov 109  }
 0x1b8   :  { %255 = vrot.lane.b32.xlu1 %v1313_v41, %s1182_s29  ;;  %283 = vrot.lane.b32.xlu0 %v1311_v40, %s1184_s8  ;;  %s1212_s29 = smov 99  }
 0x1bc   :  { %270 = vrot.lane.b32.xlu1 %v1313_v41, %s1183_s30  ;;  %298 = vrot.lane.b32.xlu0 %v1311_v40, %s1185_s9  ;;  %s1213_s30 = smov 98  }
 0x1c0   :  { %285 = vrot.lane.b32.xlu1 %v1313_v41, %s1184_s8  ;;  %313 = vrot.lane.b32.xlu0 %v1311_v40, %s1186_s10  ;;  %s1214_s8 = smov 97  }
 0x1c4   :  { %300 = vrot.lane.b32.xlu1 %v1313_v41, %s1185_s9  ;;  %328 = vrot.lane.b32.xlu0 %v1311_v40, %s1187_s11  ;;  %s1215_s9 = smov 96  }
 0x1c8   :  { %315 = vrot.lane.b32.xlu1 %v1313_v41, %s1186_s10  ;;  %343 = vrot.lane.b32.xlu0 %v1311_v40, %s1188_s12  ;;  %s1216_s10 = smov 95  }
 0x1cc   :  { %330 = vrot.lane.b32.xlu1 %v1313_v41, %s1187_s11  ;;  %358 = vrot.lane.b32.xlu0 %v1311_v40, %s1189_s13  ;;  %s1217_s11 = smov 94  }
 0x1d0   :  { %345 = vrot.lane.b32.xlu1 %v1313_v41, %s1188_s12  ;;  %373 = vrot.lane.b32.xlu0 %v1311_v40, %s1190_s14  ;;  %s1218_s12 = smov 93  }
 0x1d4   :  { %360 = vrot.lane.b32.xlu1 %v1313_v41, %s1189_s13  ;;  %388 = vrot.lane.b32.xlu0 %v1311_v40, %s1191_s15  ;;  %s1219_s13 = smov 83  }
 0x1d8   :  { %375 = vrot.lane.b32.xlu1 %v1313_v41, %s1190_s14  ;;  %403 = vrot.lane.b32.xlu0 %v1311_v40, %s1192_s16  ;;  %s1220_s14 = smov 82  }
 0x1dc   :  { %390 = vrot.lane.b32.xlu1 %v1313_v41, %s1191_s15  ;;  %418 = vrot.lane.b32.xlu0 %v1311_v40, %s1193_s17  ;;  %s1221_s15 = smov 81  }
 0x1e0   :  { %405 = vrot.lane.b32.xlu1 %v1313_v41, %s1192_s16  ;;  %433 = vrot.lane.b32.xlu0 %v1311_v40, %s1194_s2  ;;  %s1222_s16 = smov 80  }
 0x1e4   :  { %420 = vrot.lane.b32.xlu1 %v1313_v41, %s1193_s17  ;;  %448 = vrot.lane.b32.xlu0 %v1311_v40, %s1195_s18  ;;  %s1223_s17 = smov 79  }
 0x1e8   :  { %435 = vrot.lane.b32.xlu1 %v1313_v41, %s1194_s2  ;;  %463 = vrot.lane.b32.xlu0 %v1311_v40, %s1196_s19  ;;  %s1224_s2 = smov 78  }
 0x1ec   :  { %450 = vrot.lane.b32.xlu1 %v1313_v41, %s1195_s18  ;;  %478 = vrot.lane.b32.xlu0 %v1311_v40, %s1197_s20  ;;  %s1225_s18 = smov 77  }
 0x1f0   :  { %465 = vrot.lane.b32.xlu1 %v1313_v41, %s1196_s19  ;;  %493 = vrot.lane.b32.xlu0 %v1311_v40, %s1198_s0  ;;  %s1226_s19 = smov [#allocation10]  }
 0x1f4   :  { %480 = vrot.lane.b32.xlu1 %v1313_v41, %s1197_s20  ;;  %508 = vrot.lane.b32.xlu0 %v1311_v40, %s1199_s6  ;;  %s990_s20 = sshll.u32 %s1226_s19, 4  ;;  %s991_s20 = int_to_ptr.vmem [resolvable:$true] %s990_s20 }
 0x1f5   :  { %p1148_p7 = scmp.lt.s32.totalorder %s991_s20, %s991_s20 }
 0x1f8   :  { %495 = vrot.lane.b32.xlu1 %v1313_v41, %s1198_s0  ;;  %523 = vrot.lane.b32.xlu0 %v1311_v40, %s1200_s5  ;;  %s1143_s0 = scalar_lea.vmem %s991_s20, 256 }
 0x1f9   :  { %p1144_p6 = scmp.ne.s32.totalorder %s991_s20, %s1143_s0  ;;  %p1149_p8 = scmp.lt.s32.totalorder %s1143_s0, %s1143_s0 }
 0x1fb   :  { %p1150_p9 = por %p1149_p8, %p1148_p7 }
 0x1fc   :  { %510 = vrot.lane.b32.xlu1 %v1313_v41, %s1199_s6  ;;  %538 = vrot.lane.b32.xlu0 %v1311_v40, %s1201_s21 }
 0x1fd   :  { %p1151_p10 = pnand %p1150_p9, %p1144_p6 }
 0x200   :  { %525 = vrot.lane.b32.xlu1 %v1313_v41, %s1200_s5  ;;  %561 = vrot.lane.b32.xlu0 %v1311_v40, %s1202_s22 }
 0x204   :  { %540 = vrot.lane.b32.xlu1 %v1313_v41, %s1201_s21  ;;  %576 = vrot.lane.b32.xlu0 %v1311_v40, %s1203_s23 }
 0x208   :  { %563 = vrot.lane.b32.xlu1 %v1313_v41, %s1202_s22  ;;  %591 = vrot.lane.b32.xlu0 %v1311_v40, %s1204_s3 }
 0x20c   :  { %578 = vrot.lane.b32.xlu1 %v1313_v41, %s1203_s23  ;;  %606 = vrot.lane.b32.xlu0 %v1311_v40, %s1205_s24 }
 0x210   :  { %593 = vrot.lane.b32.xlu1 %v1313_v41, %s1204_s3  ;;  %621 = vrot.lane.b32.xlu0 %v1311_v40, %s1206_s1 }
 0x214   :  { %608 = vrot.lane.b32.xlu1 %v1313_v41, %s1205_s24  ;;  %636 = vrot.lane.b32.xlu0 %v1311_v40, %s1207_s25 }
 0x216   :  { %v199_v45 = vpop.permute.xlu1 %198  ;;  %v197_v46 = vpop.permute.xlu0 %196 }
 0x217   :  { %v203_v47 = vsel %vm202_vm5, %v197_v46, %v199_v45  ;;  %v204_v48 = vsel %vm202_vm5, %v199_v45, %v197_v46  ;;  %vm437_vm5 = vcmp.lt.s32.totalorder %v1370_v44, 17 }
 0x218   :  { %v208_v49 = vcombine.low %v204_v48, %v203_v47  ;;  %623 = vrot.lane.b32.xlu1 %v1313_v41, %s1206_s1  ;;  %651 = vrot.lane.b32.xlu0 %v1311_v40, %s1208_s4 }
 0x21a   :  { %v212_v32 = vpop.permute.xlu1 %211  ;;  %v226_v50 = vpop.permute.xlu0 %225  ;;  %v210_v10 = vmul.f32 %v208_v49, %v205_v4 }
 0x21c   :  { %638 = vrot.lane.b32.xlu1 %v1313_v41, %s1207_s25  ;;  %666 = vrot.lane.b32.xlu0 %v1311_v40, %s1209_s26 }
 0x21e   :  { %v214_v51 = vpop.permute.xlu1 %213  ;;  %v240_v52 = vpop.permute.xlu0 %239 }
 0x21f   :  { %v216_v53 = vsel %vm215_vm6, %v212_v32, %v214_v51  ;;  %v217_v54 = vsel %vm215_vm6, %v214_v51, %v212_v32  ;;  %v321_v51 = vld [vmem:[#allocation8 + $0x40] sm:$0xff]  ;;  %vm452_vm6 = vcmp.lt.s32.totalorder %v1370_v44, 16 }
 0x220   :  { %v222_v55 = vcombine.low %v217_v54, %v216_v53  ;;  %653 = vrot.lane.b32.xlu1 %v1313_v41, %s1208_s4  ;;  %681 = vrot.lane.b32.xlu0 %v1311_v40, %s1210_s27 }
 0x222   :  { %v228_v56 = vpop.permute.xlu1 %227  ;;  %v254_v57 = vpop.permute.xlu0 %253  ;;  %v224_v20 = vmul.f32 %v222_v55, %v219_v14 }
 0x223   :  { %v230_v58 = vsel %vm229_vm7, %v226_v50, %v228_v56  ;;  %v231_v59 = vsel %vm229_vm7, %v228_v56, %v226_v50  ;;  %vm467_vm7 = vcmp.lt.s32.totalorder %v1370_v44, 15 }
 0x224   :  { %v236_v60 = vcombine.low %v231_v59, %v230_v58  ;;  %668 = vrot.lane.b32.xlu1 %v1313_v41, %s1209_s26  ;;  %696 = vrot.lane.b32.xlu0 %v1311_v40, %s1211_s28  ;;  %v336_v59 = vld [vmem:[#allocation8 + $0x48] sm:$0xff] }
 0x226   :  { %v242_v61 = vpop.permute.xlu1 %241  ;;  %v269_v62 = vpop.permute.xlu0 %268  ;;  %v238_v30 = vmul.f32 %v236_v60, %v233_v24 }
 0x227   :  { %v244_v63 = vsel %vm243_vm8, %v240_v52, %v242_v61  ;;  %v245_v0 = vsel %vm243_vm8, %v242_v61, %v240_v52  ;;  %vm482_vm8 = vcmp.lt.s32.totalorder %v1370_v44, 14 }
 0x228   :  { %v250_v1 = vcombine.low %v245_v0, %v244_v63  ;;  %683 = vrot.lane.b32.xlu1 %v1313_v41, %s1210_s27  ;;  %711 = vrot.lane.b32.xlu0 %v1311_v40, %s1212_s29 }
 0x22a   :  { %v256_v2 = vpop.permute.xlu1 %255  ;;  %v284_v3 = vpop.permute.xlu0 %283  ;;  %v252_v48 = vmul.f32 %v250_v1, %v247_v37 }
 0x22b   :  { %v258_v7 = vsel %vm257_vm9, %v254_v57, %v256_v2  ;;  %v259_v8 = vsel %vm257_vm9, %v256_v2, %v254_v57  ;;  %vm497_vm9 = vcmp.lt.s32.totalorder %v1370_v44, 13 }
 0x22c   :  { %v264_v9 = vcombine.low %v259_v8, %v258_v7  ;;  %698 = vrot.lane.b32.xlu1 %v1313_v41, %s1211_s28  ;;  %726 = vrot.lane.b32.xlu0 %v1311_v40, %s1213_s30 }
 0x22e   :  { %v266_v11 = vmul.f32 %v264_v9, %v261_v5  ;;  %v271_v12 = vpop.permute.xlu1 %270  ;;  %v299_v13 = vpop.permute.xlu0 %298 }
 0x22f   :  { %v273_v16 = vsel %vm272_vm10, %v269_v62, %v271_v12  ;;  %v274_v17 = vsel %vm272_vm10, %v271_v12, %v269_v62  ;;  %v366_v12 = vld [vmem:[#allocation8 + $0x58] sm:$0xff]  ;;  %vm512_vm10 = vcmp.lt.s32.totalorder %v1370_v44, 3 }
 0x230   :  { %v267_v18 = vadd.f32 %v266_v11, %v210_v10  ;;  %v279_v19 = vcombine.low %v274_v17, %v273_v16  ;;  %713 = vrot.lane.b32.xlu1 %v1313_v41, %s1212_s29  ;;  %741 = vrot.lane.b32.xlu0 %v1311_v40, %s1214_s8 }
 0x232   :  { %v281_v21 = vmul.f32 %v279_v19, %v276_v15  ;;  %v286_v22 = vpop.permute.xlu1 %285  ;;  %v314_v23 = vpop.permute.xlu0 %313 }
 0x233   :  { %v288_v26 = vsel %vm287_vm11, %v284_v3, %v286_v22  ;;  %v289_v27 = vsel %vm287_vm11, %v286_v22, %v284_v3  ;;  %v351_v3 = vld [vmem:[#allocation8 + $0x50] sm:$0xff]  ;;  %vm527_vm11 = vcmp.lt.s32.totalorder %v1370_v44, 2 }
 0x234   :  { %v282_v28 = vadd.f32 %v281_v21, %v224_v20  ;;  %v294_v29 = vcombine.low %v289_v27, %v288_v26  ;;  %728 = vrot.lane.b32.xlu1 %v1313_v41, %s1213_s30  ;;  %756 = vrot.lane.b32.xlu0 %v1311_v40, %s1215_s9  ;;  %v381_v20 = vld [vmem:[#allocation8 + $0x60] sm:$0xff] }
 0x236   :  { %v296_v31 = vmul.f32 %v294_v29, %v291_v25  ;;  %v301_v35 = vpop.permute.xlu1 %300  ;;  %v329_v36 = vpop.permute.xlu0 %328 }
 0x237   :  { %v303_v39 = vsel %vm302_vm12, %v299_v13, %v301_v35  ;;  %v304_v45 = vsel %vm302_vm12, %v301_v35, %v299_v13  ;;  %vm542_vm12 = vcmp.lt.s32.totalorder %v1370_v44, 1 }
 0x238   :  { %v297_v46 = vadd.f32 %v296_v31, %v238_v30  ;;  %v309_v47 = vcombine.low %v304_v45, %v303_v39  ;;  %743 = vrot.lane.b32.xlu1 %v1313_v41, %s1214_s8  ;;  %771 = vrot.lane.b32.xlu0 %v1311_v40, %s1216_s10  ;;  %v411_v39 = vld [vmem:[#allocation8 + $0x70] sm:$0xff] }
 0x23a   :  { %v311_v49 = vmul.f32 %v309_v47, %v306_v38  ;;  %v316_v32 = vpop.permute.xlu1 %315  ;;  %v344_v50 = vpop.permute.xlu0 %343 }
 0x23b   :  { %v318_v52 = vsel %vm317_vm13, %v314_v23, %v316_v32  ;;  %v319_v53 = vsel %vm317_vm13, %v316_v32, %v314_v23  ;;  %vm565_vm13 = vcmp.lt.s32.totalorder %v1370_v44, 127 }
 0x23c   :  { %v312_v54 = vadd.f32 %v311_v49, %v252_v48  ;;  %v324_v55 = vcombine.low %v319_v53, %v318_v52  ;;  %758 = vrot.lane.b32.xlu1 %v1313_v41, %s1215_s9  ;;  %786 = vrot.lane.b32.xlu0 %v1311_v40, %s1217_s11 }
 0x23e   :  { %v326_v56 = vmul.f32 %v324_v55, %v321_v51  ;;  %v331_v57 = vpop.permute.xlu1 %330  ;;  %v359_v58 = vpop.permute.xlu0 %358  ;;  %v426_v51 = vld [vmem:[#allocation8 + $0x78] sm:$0xff] }
 0x23f   :  { %v333_v60 = vsel %vm332_vm14, %v329_v36, %v331_v57  ;;  %v334_v61 = vsel %vm332_vm14, %v331_v57, %v329_v36  ;;  %vm580_vm14 = vcmp.lt.s32.totalorder %v1370_v44, 126 }
 0x240   :  { %v327_v62 = vadd.f32 %v326_v56, %v267_v18  ;;  %v339_v63 = vcombine.low %v334_v61, %v333_v60  ;;  %773 = vrot.lane.b32.xlu1 %v1313_v41, %s1216_s10  ;;  %801 = vrot.lane.b32.xlu0 %v1311_v40, %s1218_s12 }
 0x242   :  { %v341_v0 = vmul.f32 %v339_v63, %v336_v59  ;;  %v346_v1 = vpop.permute.xlu1 %345  ;;  %v374_v2 = vpop.permute.xlu0 %373  ;;  %v441_v59 = vld [vmem:[#allocation8 + $0x80] sm:$0xff] }
 0x243   :  { %v348_v4 = vsel %vm347_vm15, %v344_v50, %v346_v1  ;;  %v349_v5 = vsel %vm347_vm15, %v346_v1, %v344_v50  ;;  %vm595_vm15 = vcmp.lt.s32.totalorder %v1370_v44, 125 }
 0x244   :  { %v342_v7 = vadd.f32 %v341_v0, %v282_v28  ;;  %v354_v8 = vcombine.low %v349_v5, %v348_v4  ;;  %788 = vrot.lane.b32.xlu1 %v1313_v41, %s1217_s11  ;;  %816 = vrot.lane.b32.xlu0 %v1311_v40, %s1219_s13  ;;  %v396_v28 = vld [vmem:[#allocation8 + $0x68] sm:$0xff] }
 0x246   :  { %v356_v9 = vmul.f32 %v354_v8, %v351_v3  ;;  %v361_v10 = vpop.permute.xlu1 %360  ;;  %v389_v11 = vpop.permute.xlu0 %388  ;;  %v456_v3 = vld [vmem:[#allocation8 + $0x88] sm:$0xff] }
 0x247   :  { %v363_v13 = vsel %vm362_vm0, %v359_v58, %v361_v10  ;;  %v364_v14 = vsel %vm362_vm0, %v361_v10, %v359_v58  ;;  %vm610_vm0 = vcmp.lt.s32.totalorder %v1370_v44, 115 }
 0x248   :  { %v357_v15 = vadd.f32 %v356_v9, %v297_v46  ;;  %v369_v16 = vcombine.low %v364_v14, %v363_v13  ;;  %803 = vrot.lane.b32.xlu1 %v1313_v41, %s1218_s12  ;;  %831 = vrot.lane.b32.xlu0 %v1311_v40, %s1220_s14 }
 0x24a   :  { %v371_v17 = vmul.f32 %v369_v16, %v366_v12  ;;  %v376_v18 = vpop.permute.xlu1 %375  ;;  %v404_v19 = vpop.permute.xlu0 %403  ;;  %v471_v12 = vld [vmem:[#allocation8 + $0x90] sm:$0xff] }
 0x24b   :  { %v378_v21 = vsel %vm377_vm1, %v374_v2, %v376_v18  ;;  %v379_v22 = vsel %vm377_vm1, %v376_v18, %v374_v2  ;;  %vm625_vm1 = vcmp.lt.s32.totalorder %v1370_v44, 114 }
 0x24c   :  { %v372_v23 = vadd.f32 %v371_v17, %v312_v54  ;;  %v384_v24 = vcombine.low %v379_v22, %v378_v21  ;;  %818 = vrot.lane.b32.xlu1 %v1313_v41, %s1219_s13  ;;  %846 = vrot.lane.b32.xlu0 %v1311_v40, %s1221_s15 }
 0x24e   :  { %v386_v25 = vmul.f32 %v384_v24, %v381_v20  ;;  %v391_v26 = vpop.permute.xlu1 %390  ;;  %v419_v27 = vpop.permute.xlu0 %418  ;;  %v486_v20 = vld [vmem:[#allocation8 + $0x98] sm:$0xff] }
 0x24f   :  { %v393_v29 = vsel %vm392_vm2, %v389_v11, %v391_v26  ;;  %v394_v30 = vsel %vm392_vm2, %v391_v26, %v389_v11  ;;  %vm640_vm2 = vcmp.lt.s32.totalorder %v1370_v44, 113 }
 0x250   :  { %v387_v31 = vadd.f32 %v386_v25, %v327_v62  ;;  %v399_v35 = vcombine.low %v394_v30, %v393_v29  ;;  %833 = vrot.lane.b32.xlu1 %v1313_v41, %s1220_s14  ;;  %861 = vrot.lane.b32.xlu0 %v1311_v40, %s1222_s16 }
 0x252   :  { %v401_v36 = vmul.f32 %v399_v35, %v396_v28  ;;  %v406_v37 = vpop.permute.xlu1 %405  ;;  %v434_v38 = vpop.permute.xlu0 %433 }
 0x253   :  { %v408_v45 = vsel %vm407_vm3, %v404_v19, %v406_v37  ;;  %v409_v46 = vsel %vm407_vm3, %v406_v37, %v404_v19  ;;  %vm655_vm3 = vcmp.lt.s32.totalorder %v1370_v44, 112 }
 0x254   :  { %v402_v47 = vadd.f32 %v401_v36, %v342_v7  ;;  %v414_v48 = vcombine.low %v409_v46, %v408_v45  ;;  %848 = vrot.lane.b32.xlu1 %v1313_v41, %s1221_s15  ;;  %876 = vrot.lane.b32.xlu0 %v1311_v40, %s1223_s17 }
 0x256   :  { %v416_v49 = vmul.f32 %v414_v48, %v411_v39  ;;  %v421_v32 = vpop.permute.xlu1 %420  ;;  %v449_v50 = vpop.permute.xlu0 %448 }
 0x257   :  { %v423_v52 = vsel %vm422_vm4, %v419_v27, %v421_v32  ;;  %v424_v53 = vsel %vm422_vm4, %v421_v32, %v419_v27  ;;  %v501_v27 = vld [vmem:[#allocation8 + $0xa0] sm:$0xff]  ;;  %vm670_vm4 = vcmp.lt.s32.totalorder %v1370_v44, 111 }
 0x258   :  { %v417_v54 = vadd.f32 %v416_v49, %v357_v15  ;;  %v429_v55 = vcombine.low %v424_v53, %v423_v52  ;;  %863 = vrot.lane.b32.xlu1 %v1313_v41, %s1222_s16  ;;  %891 = vrot.lane.b32.xlu0 %v1311_v40, %s1224_s2 }
 0x25a   :  { %v431_v56 = vmul.f32 %v429_v55, %v426_v51  ;;  %v436_v57 = vpop.permute.xlu1 %435  ;;  %v464_v58 = vpop.permute.xlu0 %463 }
 0x25b   :  { %v438_v60 = vsel %vm437_vm5, %v434_v38, %v436_v57  ;;  %v439_v61 = vsel %vm437_vm5, %v436_v57, %v434_v38  ;;  %v516_v38 = vld [vmem:[#allocation8 + $0xa8] sm:$0xff]  ;;  %vm685_vm5 = vcmp.lt.s32.totalorder %v1370_v44, 110 }
 0x25c   :  { %v432_v62 = vadd.f32 %v431_v56, %v372_v23  ;;  %v444_v63 = vcombine.low %v439_v61, %v438_v60  ;;  %878 = vrot.lane.b32.xlu1 %v1313_v41, %s1223_s17  ;;  %906 = vrot.lane.b32.xlu0 %v1311_v40, %s1225_s18 }
 0x25e   :  { %v446_v0 = vmul.f32 %v444_v63, %v441_v59  ;;  %v451_v1 = vpop.permute.xlu1 %450  ;;  %v479_v2 = vpop.permute.xlu0 %478 }
 0x25f   :  { %v453_v4 = vsel %vm452_vm6, %v449_v50, %v451_v1  ;;  %v454_v5 = vsel %vm452_vm6, %v451_v1, %v449_v50  ;;  %v531_v50 = vld [vmem:[#allocation8 + $0xb0] sm:$0xff]  ;;  %vm700_vm6 = vcmp.lt.s32.totalorder %v1370_v44, 109 }
 0x260   :  { %v447_v7 = vadd.f32 %v446_v0, %v387_v31  ;;  %v459_v8 = vcombine.low %v454_v5, %v453_v4  ;;  %893 = vrot.lane.b32.xlu1 %v1313_v41, %s1224_s2  ;;  %938 = vperm.xlu0 %1062, %v1282_v6  }
 0x262   :  { %v461_v9 = vmul.f32 %v459_v8, %v456_v3  ;;  %v466_v10 = vpop.permute.xlu1 %465  ;;  %v494_v11 = vpop.permute.xlu0 %493 }
 0x263   :  { %v468_v13 = vsel %vm467_vm7, %v464_v58, %v466_v10  ;;  %v469_v14 = vsel %vm467_vm7, %v466_v10, %v464_v58  ;;  %v546_v58 = vld [vmem:[#allocation8 + $0xb8] sm:$0xff]  ;;  %vm715_vm7 = vcmp.lt.s32.totalorder %v1370_v44, 99 }
 0x264   :  { %v462_v15 = vadd.f32 %v461_v9, %v402_v47  ;;  %v474_v16 = vcombine.low %v469_v14, %v468_v13  ;;  %908 = vrot.lane.b32.xlu1 %v1313_v41, %s1225_s18 }
 0x266   :  { %v476_v17 = vmul.f32 %v474_v16, %v471_v12  ;;  %v481_v18 = vpop.permute.xlu1 %480  ;;  %v509_v19 = vpop.permute.xlu0 %508 }
 0x267   :  { %v483_v21 = vsel %vm482_vm8, %v479_v2, %v481_v18  ;;  %v484_v22 = vsel %vm482_vm8, %v481_v18, %v479_v2  ;;  %v569_v2 = vld [vmem:[#allocation8 + $0xc8] sm:$0xff]  ;;  %vm730_vm8 = vcmp.lt.s32.totalorder %v1370_v44, 98 }
 0x268   :  { %v477_v23 = vadd.f32 %v476_v17, %v417_v54  ;;  %v489_v6 = vcombine.low %v484_v22, %v483_v21 }
 0x26a   :  { %v491_v24 = vmul.f32 %v489_v6, %v486_v20  ;;  %v496_v25 = vpop.permute.xlu1 %495  ;;  %v524_v26 = vpop.permute.xlu0 %523  ;;  %v557_v6 = vcombine.low %v1311_v40, %v1313_v41 }
 0x26b   :  { %v498_v28 = vsel %vm497_vm9, %v494_v11, %v496_v25  ;;  %v499_v29 = vsel %vm497_vm9, %v496_v25, %v494_v11  ;;  %v584_v11 = vld [vmem:[#allocation8 + $0xd0] sm:$0xff]  ;;  %vm745_vm9 = vcmp.lt.s32.totalorder %v1370_v44, 97 }
 0x26c   :  { %v492_v30 = vadd.f32 %v491_v24, %v432_v62  ;;  %v504_v31 = vcombine.low %v499_v29, %v498_v28  ;;  %v554_v24 = vld [vmem:[#allocation8 + $0xc0] sm:$0xff] }
 0x26d   :  { %v614_v28 = vld [vmem:[#allocation8 + $0xe0] sm:$0xff] }
 0x26e   :  { %v506_v35 = vmul.f32 %v504_v31, %v501_v27  ;;  %v511_v36 = vpop.permute.xlu1 %510  ;;  %v539_v37 = vpop.permute.xlu0 %538 }
 0x26f   :  { %v513_v39 = vsel %vm512_vm10, %v509_v19, %v511_v36  ;;  %v514_v45 = vsel %vm512_vm10, %v511_v36, %v509_v19  ;;  %v599_v19 = vld [vmem:[#allocation8 + $0xd8] sm:$0xff]  ;;  %vm760_vm10 = vcmp.lt.s32.totalorder %v1370_v44, 96 }
 0x270   :  { %v507_v46 = vadd.f32 %v506_v35, %v447_v7  ;;  %v519_v47 = vcombine.low %v514_v45, %v513_v39  ;;  %v559_v35 = vmul.f32 %v557_v6, %v554_v24 }
 0x272   :  { %v521_v48 = vmul.f32 %v519_v47, %v516_v38  ;;  %v526_v49 = vpop.permute.xlu1 %525  ;;  %v562_v32 = vpop.permute.xlu0 %561  ;;  %v629_v47 = vld [vmem:[#allocation8 + $0xe8] sm:$0xff] }
 0x273   :  { %v528_v51 = vsel %vm527_vm11, %v524_v26, %v526_v49  ;;  %v529_v52 = vsel %vm527_vm11, %v526_v49, %v524_v26  ;;  %vm775_vm11 = vcmp.lt.s32.totalorder %v1370_v44, 95 }
 0x274   :  { %v522_v53 = vadd.f32 %v521_v48, %v462_v15  ;;  %v534_v54 = vcombine.low %v529_v52, %v528_v51  ;;  %v644_v52 = vld [vmem:[#allocation8 + $0xf0] sm:$0xff] }
 0x276   :  { %v536_v55 = vmul.f32 %v534_v54, %v531_v50  ;;  %v541_v56 = vpop.permute.xlu1 %540  ;;  %v577_v57 = vpop.permute.xlu0 %576 }
 0x277   :  { %v543_v59 = vsel %vm542_vm12, %v539_v37, %v541_v56  ;;  %v544_v60 = vsel %vm542_vm12, %v541_v56, %v539_v37  ;;  %v560_v37 = vadd.f32 %v559_v35, %v507_v46  ;;  %vm790_vm12 = vcmp.lt.s32.totalorder %v1370_v44, 94 }
 0x278   :  { %v537_v61 = vadd.f32 %v536_v55, %v477_v23  ;;  %v549_v62 = vcombine.low %v544_v60, %v543_v59  ;;  %v659_v59 = vld [vmem:[#allocation8 + $0xf8] sm:$0xff] }
 0x27a   :  { %v551_v63 = vmul.f32 %v549_v62, %v546_v58  ;;  %v564_v0 = vpop.permute.xlu1 %563  ;;  %v592_v1 = vpop.permute.xlu0 %591 }
 0x27b   :  { %v566_v3 = vsel %vm565_vm13, %v562_v32, %v564_v0  ;;  %v567_v4 = vsel %vm565_vm13, %v564_v0, %v562_v32  ;;  %vm805_vm13 = vcmp.lt.s32.totalorder %v1370_v44, 93 }
 0x27c   :  { %v552_v5 = vadd.f32 %v551_v63, %v492_v30  ;;  %v572_v7 = vcombine.low %v566_v3, %v567_v4  ;;  %v674_v3 = vld [vmem:[#allocation8 + $0x100] sm:$0xff] }
 0x27e   :  { %v574_v8 = vmul.f32 %v572_v7, %v569_v2  ;;  %v579_v9 = vpop.permute.xlu1 %578  ;;  %v607_v10 = vpop.permute.xlu0 %606 }
 0x27f   :  { %v581_v12 = vsel %vm580_vm14, %v577_v57, %v579_v9  ;;  %v582_v13 = vsel %vm580_vm14, %v579_v9, %v577_v57  ;;  %vm820_vm14 = vcmp.lt.s32.totalorder %v1370_v44, 83 }
 0x280   :  { %v575_v14 = vadd.f32 %v574_v8, %v522_v53  ;;  %v587_v15 = vcombine.low %v581_v12, %v582_v13  ;;  %v689_v12 = vld [vmem:[#allocation8 + $0x108] sm:$0xff] }
 0x282   :  { %v589_v16 = vmul.f32 %v587_v15, %v584_v11  ;;  %v594_v17 = vpop.permute.xlu1 %593  ;;  %v622_v18 = vpop.permute.xlu0 %621 }
 0x283   :  { %v596_v20 = vsel %vm595_vm15, %v592_v1, %v594_v17  ;;  %v597_v21 = vsel %vm595_vm15, %v594_v17, %v592_v1  ;;  %vm835_vm15 = vcmp.lt.s32.totalorder %v1370_v44, 82 }
 0x284   :  { %v590_v22 = vadd.f32 %v589_v16, %v537_v61  ;;  %v602_v23 = vcombine.low %v596_v20, %v597_v21  ;;  %v704_v20 = vld [vmem:[#allocation8 + $0x110] sm:$0xff] }
 0x286   :  { %v604_v25 = vmul.f32 %v602_v23, %v599_v19  ;;  %v609_v26 = vpop.permute.xlu1 %608  ;;  %v637_v27 = vpop.permute.xlu0 %636 }
 0x287   :  { %v611_v29 = vsel %vm610_vm0, %v607_v10, %v609_v26  ;;  %v612_v30 = vsel %vm610_vm0, %v609_v26, %v607_v10  ;;  %vm850_vm0 = vcmp.lt.s32.totalorder %v1370_v44, 81 }
 0x288   :  { %v605_v31 = vadd.f32 %v604_v25, %v552_v5  ;;  %v617_v36 = vcombine.low %v611_v29, %v612_v30 }
 0x28a   :  { %v619_v38 = vmul.f32 %v617_v36, %v614_v28  ;;  %v624_v39 = vpop.permute.xlu1 %623  ;;  %v652_v45 = vpop.permute.xlu0 %651 }
 0x28b   :  { %v626_v48 = vsel %vm625_vm1, %v622_v18, %v624_v39  ;;  %v627_v49 = vsel %vm625_vm1, %v624_v39, %v622_v18  ;;  %vm865_vm1 = vcmp.lt.s32.totalorder %v1370_v44, 80 }
 0x28c   :  { %v620_v40 = vadd.f32 %v619_v38, %v560_v37  ;;  %v632_v41 = vcombine.low %v626_v48, %v627_v49  ;;  %v734_v38 = vld [vmem:[#allocation8 + $0x120] sm:$0xff] }
 0x28e   :  { %v634_v32 = vmul.f32 %v632_v41, %v629_v47  ;;  %v639_v50 = vpop.permute.xlu1 %638  ;;  %v667_v51 = vpop.permute.xlu0 %666 }
 0x28f   :  { %v641_v53 = vsel %vm640_vm2, %v637_v27, %v639_v50  ;;  %v642_v54 = vsel %vm640_vm2, %v639_v50, %v637_v27  ;;  %v719_v27 = vld [vmem:[#allocation8 + $0x118] sm:$0xff]  ;;  %vm880_vm2 = vcmp.lt.s32.totalorder %v1370_v44, 79 }
 0x290   :  { %v635_v55 = vadd.f32 %v634_v32, %v575_v14  ;;  %v647_v56 = vcombine.low %v641_v53, %v642_v54  ;;  %v749_v32 = vld [vmem:[#allocation8 + $0x128] sm:$0xff] }
 0x292   :  { %v649_v46 = vmul.f32 %v647_v56, %v644_v52  ;;  %v654_v57 = vpop.permute.xlu1 %653  ;;  %v682_v58 = vpop.permute.xlu0 %681 }
 0x293   :  { %v656_v60 = vsel %vm655_vm3, %v652_v45, %v654_v57  ;;  %v657_v61 = vsel %vm655_vm3, %v654_v57, %v652_v45  ;;  %vm895_vm3 = vcmp.lt.s32.totalorder %v1370_v44, 78 }
 0x294   :  { %v650_v62 = vadd.f32 %v649_v46, %v590_v22  ;;  %v662_v63 = vcombine.low %v656_v60, %v657_v61  ;;  %v764_v46 = vld [vmem:[#allocation8 + $0x130] sm:$0xff] }
 0x296   :  { %v664_v0 = vmul.f32 %v662_v63, %v659_v59  ;;  %v669_v1 = vpop.permute.xlu1 %668  ;;  %v697_v2 = vpop.permute.xlu0 %696 }
 0x297   :  { %v671_v4 = vsel %vm670_vm4, %v667_v51, %v669_v1  ;;  %v672_v5 = vsel %vm670_vm4, %v669_v1, %v667_v51  ;;  %vm910_vm4 = vcmp.lt.s32.totalorder %v1370_v44, 77  ;;  %v948_v44 = vsub.s32 4, %v1289_v33 }
 0x298   :  { %v665_v7 = vadd.f32 %v664_v0, %v605_v31  ;;  %v677_v8 = vcombine.low %v671_v4, %v672_v5  ;;  %v779_v0 = vld [vmem:[#allocation8 + $0x138] sm:$0xff] }
 0x29a   :  { %v679_v9 = vmul.f32 %v677_v8, %v674_v3  ;;  %v684_v10 = vpop.permute.xlu1 %683  ;;  %v712_v11 = vpop.permute.xlu0 %711 }
 0x29b   :  { %v686_v13 = vsel %vm685_vm5, %v682_v58, %v684_v10  ;;  %v687_v14 = vsel %vm685_vm5, %v684_v10, %v682_v58 }
 0x29c   :  { %v680_v15 = vadd.f32 %v679_v9, %v620_v40  ;;  %v692_v16 = vcombine.low %v686_v13, %v687_v14  ;;  %v794_v9 = vld [vmem:[#allocation8 + $0x140] sm:$0xff] }
 0x29e   :  { %v694_v17 = vmul.f32 %v692_v16, %v689_v12  ;;  %v699_v18 = vpop.permute.xlu1 %698  ;;  %v727_v19 = vpop.permute.xlu0 %726 }
 0x29f   :  { %v701_v21 = vsel %vm700_vm6, %v697_v2, %v699_v18  ;;  %v702_v22 = vsel %vm700_vm6, %v699_v18, %v697_v2 }
 0x2a0   :  { %v695_v23 = vadd.f32 %v694_v17, %v635_v55  ;;  %v707_v6 = vcombine.low %v701_v21, %v702_v22  ;;  %v809_v17 = vld [vmem:[#allocation8 + $0x148] sm:$0xff] }
 0x2a2   :  { %v709_v24 = vmul.f32 %v707_v6, %v704_v20  ;;  %v714_v25 = vpop.permute.xlu1 %713  ;;  %v742_v26 = vpop.permute.xlu0 %741 }
 0x2a3   :  { %v716_v28 = vsel %vm715_vm7, %v712_v11, %v714_v25  ;;  %v717_v29 = vsel %vm715_vm7, %v714_v25, %v712_v11 }
 0x2a4   :  { %v710_v30 = vadd.f32 %v709_v24, %v650_v62  ;;  %v722_v31 = vcombine.low %v716_v28, %v717_v29  ;;  %v824_v24 = vld [vmem:[#allocation8 + $0x150] sm:$0xff] }
 0x2a6   :  { %v724_v35 = vmul.f32 %v722_v31, %v719_v27  ;;  %v729_v36 = vpop.permute.xlu1 %728  ;;  %v757_v37 = vpop.permute.xlu0 %756  ;;  %v839_v31 = vld [vmem:[#allocation8 + $0x158] sm:$0xff] }
 0x2a7   :  { %v731_v39 = vsel %vm730_vm8, %v727_v19, %v729_v36  ;;  %v732_v45 = vsel %vm730_vm8, %v729_v36, %v727_v19 }
 0x2a8   :  { %v725_v47 = vadd.f32 %v724_v35, %v665_v7  ;;  %v737_v48 = vcombine.low %v731_v39, %v732_v45 }
 0x2aa   :  { %v739_v49 = vmul.f32 %v737_v48, %v734_v38  ;;  %v744_v40 = vpop.permute.xlu1 %743  ;;  %v772_v41 = vpop.permute.xlu0 %771  ;;  %v854_v48 = vld [vmem:[#allocation8 + $0x160] sm:$0xff] }
 0x2ab   :  { %v746_v50 = vsel %vm745_vm9, %v742_v26, %v744_v40  ;;  %v747_v51 = vsel %vm745_vm9, %v744_v40, %v742_v26 }
 0x2ac   :  { %v740_v52 = vadd.f32 %v739_v49, %v680_v15  ;;  %v752_v53 = vcombine.low %v746_v50, %v747_v51 }
 0x2ae   :  { %v754_v54 = vmul.f32 %v752_v53, %v749_v32  ;;  %v759_v55 = vpop.permute.xlu1 %758  ;;  %v787_v56 = vpop.permute.xlu0 %786  ;;  %v869_v53 = vld [vmem:[#allocation8 + $0x168] sm:$0xff] }
 0x2af   :  { %v761_v57 = vsel %vm760_vm10, %v757_v37, %v759_v55  ;;  %v762_v58 = vsel %vm760_vm10, %v759_v55, %v757_v37 }
 0x2b0   :  { %v755_v59 = vadd.f32 %v754_v54, %v695_v23  ;;  %v767_v60 = vcombine.low %v761_v57, %v762_v58 }
 0x2b2   :  { %v769_v61 = vmul.f32 %v767_v60, %v764_v46  ;;  %v774_v62 = vpop.permute.xlu1 %773  ;;  %v802_v63 = vpop.permute.xlu0 %801 }
 0x2b3   :  { %v776_v1 = vsel %vm775_vm11, %v772_v41, %v774_v62  ;;  %v777_v2 = vsel %vm775_vm11, %v774_v62, %v772_v41 }
 0x2b4   :  { %v770_v3 = vadd.f32 %v769_v61, %v710_v30  ;;  %v782_v4 = vcombine.low %v776_v1, %v777_v2 }
 0x2b6   :  { %v784_v5 = vmul.f32 %v782_v4, %v779_v0  ;;  %v789_v7 = vpop.permute.xlu1 %788  ;;  %v817_v8 = vpop.permute.xlu0 %816 }
 0x2b7   :  { %v791_v10 = vsel %vm790_vm12, %v787_v56, %v789_v7  ;;  %v792_v11 = vsel %vm790_vm12, %v789_v7, %v787_v56 }
 0x2b8   :  { %v785_v12 = vadd.f32 %v784_v5, %v725_v47  ;;  %v797_v13 = vcombine.low %v791_v10, %v792_v11 }
 0x2ba   :  { %v799_v14 = vmul.f32 %v797_v13, %v794_v9  ;;  %v804_v15 = vpop.permute.xlu1 %803  ;;  %v832_v16 = vpop.permute.xlu0 %831 }
 0x2bb   :  { %v806_v18 = vsel %vm805_vm13, %v802_v63, %v804_v15  ;;  %v807_v19 = vsel %vm805_vm13, %v804_v15, %v802_v63 }
 0x2bc   :  { %v800_v20 = vadd.f32 %v799_v14, %v740_v52  ;;  %v812_v21 = vcombine.low %v806_v18, %v807_v19 }
 0x2be   :  { %v814_v22 = vmul.f32 %v812_v21, %v809_v17  ;;  %v819_v23 = vpop.permute.xlu1 %818  ;;  %v847_v6 = vpop.permute.xlu0 %846 }
 0x2bf   :  { %v821_v25 = vsel %vm820_vm14, %v817_v8, %v819_v23  ;;  %v822_v26 = vsel %vm820_vm14, %v819_v23, %v817_v8 }
 0x2c0   :  { %v815_v27 = vadd.f32 %v814_v22, %v755_v59  ;;  %v827_v28 = vcombine.low %v821_v25, %v822_v26  ;;  %v884_v59 = vld [vmem:[#allocation8 + $0x170] sm:$0xff]  ;;  %v962_v26 = vsub.s32 1, %v1289_v33 }
 0x2c2   :  { %v829_v29 = vmul.f32 %v827_v28, %v824_v24  ;;  %v834_v30 = vpop.permute.xlu1 %833  ;;  %v862_v39 = vpop.permute.xlu0 %861 }
 0x2c3   :  { %v836_v35 = vsel %vm835_vm15, %v832_v16, %v834_v30  ;;  %v837_v36 = vsel %vm835_vm15, %v834_v30, %v832_v16 }
 0x2c4   :  { %v830_v37 = vadd.f32 %v829_v29, %v770_v3  ;;  %v842_v38 = vcombine.low %v836_v35, %v837_v36  ;;  %v899_v3 = vld [vmem:[#allocation8 + $0x178] sm:$0xff] }
 0x2c6   :  { %v844_v45 = vmul.f32 %v842_v38, %v839_v31  ;;  %v849_v47 = vpop.permute.xlu1 %848  ;;  %v877_v51 = vpop.permute.xlu0 %876 }
 0x2c7   :  { %v851_v49 = vsel %vm850_vm0, %v847_v6, %v849_v47  ;;  %v852_v40 = vsel %vm850_vm0, %v849_v47, %v847_v6 }
 0x2c8   :  { %v845_v41 = vadd.f32 %v844_v45, %v785_v12  ;;  %v857_v32 = vcombine.low %v851_v49, %v852_v40  ;;  %v914_v12 = vld [vmem:[#allocation8 + $0x180] sm:$0xff] }
 0x2ca   :  { %v859_v50 = vmul.f32 %v857_v32, %v854_v48  ;;  %v864_v52 = vpop.permute.xlu1 %863  ;;  %v892_v63 = vpop.permute.xlu0 %891 }
 0x2cb   :  { %v866_v54 = vsel %vm865_vm1, %v862_v39, %v864_v52  ;;  %v867_v55 = vsel %vm865_vm1, %v864_v52, %v862_v39 }
 0x2cc   :  { %v860_v56 = vadd.f32 %v859_v50, %v800_v20  ;;  %v872_v46 = vcombine.low %v866_v54, %v867_v55 }
 0x2ce   :  { %v874_v57 = vmul.f32 %v872_v46, %v869_v53  ;;  %v879_v58 = vpop.permute.xlu1 %878  ;;  %v907_v9 = vpop.permute.xlu0 %906 }
 0x2cf   :  { %v881_v60 = vsel %vm880_vm2, %v877_v51, %v879_v58  ;;  %v882_v61 = vsel %vm880_vm2, %v879_v58, %v877_v51 }
 0x2d0   :  { %v875_v62 = vadd.f32 %v874_v57, %v815_v27  ;;  %v887_v0 = vcombine.low %v881_v60, %v882_v61  ;;  %v966_v27 = vsub.s32 5, %v1289_v33 }
 0x2d2   :  { %v889_v1 = vmul.f32 %v887_v0, %v884_v59  ;;  %v894_v2 = vpop.permute.xlu1 %893 }
 0x2d3   :  { %v896_v4 = vsel %vm895_vm3, %v892_v63, %v894_v2  ;;  %v897_v5 = vsel %vm895_vm3, %v894_v2, %v892_v63 }
 0x2d4   :  { %v890_v7 = vadd.f32 %v889_v1, %v830_v37  ;;  %v902_v8 = vcombine.low %v896_v4, %v897_v5 }
 0x2d6   :  { %v904_v10 = vmul.f32 %v902_v8, %v899_v3  ;;  %v909_v11 = vpop.permute.xlu1 %908 }
 0x2d7   :  { %v911_v13 = vsel %vm910_vm4, %v907_v9, %v909_v11  ;;  %v912_v14 = vsel %vm910_vm4, %v909_v11, %v907_v9 }
 0x2d8   :  { %v905_v15 = vadd.f32 %v904_v10, %v845_v41  ;;  %v917_v16 = vcombine.low %v911_v13, %v912_v14 }
 0x2da   :  { %v922_v17 = vadd.f32 %v905_v15, %v890_v7  ;;  %v919_v18 = vmul.f32 %v917_v16, %v914_v12 }
 0x2db   :  { %v939_v28 = vpop.permute.xlu0 %938 }
 0x2dc   :  { %v920_v19 = vadd.f32 %v919_v18, %v860_v56  ;;  %vm940_vm5 = vcmp.eq.s32.totalorder %v939_v28, 1 }
 0x2de   :  { %v921_v20 = vadd.f32 %v920_v19, %v875_v62 }
 0x2e0   :  { %v923_v21 = vadd.f32 %v922_v17, %v921_v20 }
 0x2e2   :  { %v1003_v22 = vrot.slane %v923_v21, 10 }
 0x2e4   :  { %v928_v23 = vadd.f32 %v1003_v22, %v923_v21 }
 0x2e6   :  { %v1004_v6 = vmul.f32 -1.442695, %v928_v23 }
 0x2e8   :  { %1067 = vpow2.f32 %v1004_v6 }
 0x2f5   :  { %v1068_v24 = vpop.eup %1067 }
 0x2f6   :  { %v932_v25 = vadd.f32 1.0, %v1068_v24 }
 0x2f8   :  { %1069 = vrcp.f32 %v932_v25 }
 0x305   :  { %v1070_v29 = vpop.eup %1069 }
 0x306   :  { %v945_v30 = vrot.slane %v1070_v29, %v1292_v34  ;;  %v949_v31 = vrot.slane %v1070_v29, %v948_v44  ;;  %v963_v35 = vrot.slane %v1070_v29, %v962_v26  ;;  %v967_v36 = vrot.slane %v1070_v29, %v966_v27 }
 0x308   :  { %v955_v37 = vrot.slane %v945_v30, %v1292_v34  ;;  %v959_v38 = vrot.slane %v949_v31, %v1292_v34  ;;  %v973_v39 = vrot.slane %v963_v35, %v962_v26  ;;  %v977_v45 = vrot.slane %v967_v36, %v962_v26 }
 0x30a   :  { %v978_v47 = vsel %vm940_vm5, %v955_v37, %v973_v39  ;;  %v979_v48 = vsel %vm940_vm5, %v959_v38, %v977_v45 }
 0x30b   :  { %v980_v33 = vmul.f32 %v978_v47, %v1299_v42  ;;  %v981_v49 = vmul.f32 %v979_v48, %v1301_v43 }
 0x30d   :  { %982 = vst [vmem:[#allocation10] sm:$0xff] %v980_v33  ;;  %983 = vst [vmem:[#allocation10 + $0x8] sm:$0xff] %v981_v49 }
 0x30e   :  { %1154 = shalt.err (!%p1151_p10)
}
 0x30f   :  { %993 = dma.vmem_to_hbm [thread:$0]  %s991_s20, 256, %s1483_s7, [#allocation4]  }
 0x310   :  { %1169 = dma.done.wait [#allocation4], 256  }
 0x311   :  { %1170 = vsyncadd [#allocation4], 4294967040 }
 0x312   :  { %997 = vsyncpa [#allocation3], 1 }
 0x313   :  { %998 = vsyncpa [#allocation7], 1 }
 0x314   :  { %999 = vsyncpa [#allocation4], 1 }
 0x315   :  { %1000 = vsyncpa [#allocation5], 1 }

</bundles_post_ra>
